<compile_context>
chip_gen: v6e
topology: v6e:2x2x1
jax: 0.10.0
libtpu: 0.0.40
codegen_flags: <defaults>
</compile_context>

<pallas_src>
import jax
import jax.numpy as jnp
from jax.experimental import pallas as pl
from jax.experimental.pallas import tpu as pltpu


def _mlp_kernel(x_ref, w1_ref, b1_ref, w2_ref, b2_ref, w3_ref, b3_ref, o_ref):
    # Linear1 (BN folded into W1/b1) + ReLU.  Dropout = identity (eval mode).
    h = jnp.dot(x_ref[...], w1_ref[...], preferred_element_type=jnp.float32)
    h = jnp.maximum(h + b1_ref[...], 0.0).astype(jnp.bfloat16)  # bf16 intermediate

    # Linear2 (BN folded into W2/b2) + ReLU.  Dropout = identity (eval mode).
    h = jnp.dot(h, w2_ref[...], preferred_element_type=jnp.float32)
    h = jnp.maximum(h + b2_ref[...], 0.0)

    # Linear3: [H1] -> 1.  VPU multiply + lane reduce (no N=1 MXU matmul).
    o_ref[...] = jnp.sum(h * w3_ref[...], axis=-1, keepdims=True) + b3_ref[...]


def _dimension_semantics():
    """CORE_PARALLEL on v7x (2 TensorCores/chip); 'parallel' elsewhere."""
    try:
        kind = jax.devices()[0].device_kind.lower()
    except Exception:  # pragma: no cover - defensive
        kind = ""
    core_parallel = getattr(pltpu, "CORE_PARALLEL", None)
    if core_parallel is not None and "v7" in kind:
        return (core_parallel,)
    return ("parallel",)


def linear_probe_forward(x, params, tile_b=512):
    """Fused forward pass.  x: [B, D_in] (f32 or bf16) -> [B, 1] float32."""
    w1, b1, w2, b2, w3, b3 = params
    B, D_in = x.shape
    H2 = w1.shape[1]
    H1 = w2.shape[1]

    # Stream x in bf16: it is the only per-step streamed HBM input and it is
    # cast to bf16 at the MXU anyway.
    if x.dtype != jnp.bfloat16:
        x = x.astype(jnp.bfloat16)

    # Pad batch to a multiple of the tile size; slice the result back.
    b_pad = ((B + tile_b - 1) // tile_b) * tile_b
    if b_pad != B:
        x = jnp.pad(x, ((0, b_pad - B), (0, 0)))
    grid = (b_pad // tile_b,)

    # VMEM budget for this tile (double-buffered x/out, resident W1/W2,
    # f32 upper bound on the hidden activations).  Clamp to 48 MiB so the
    # limit is valid on v7x's 64 MiB physical VMEM.
    vmem_need = (
        2 * tile_b * D_in * 2                                       # x (bf16) x2
        + 2 * (w1.size * w1.dtype.itemsize + w2.size * w2.dtype.itemsize)
        + 2 * 4 * (b1.size + b2.size + w3.size + b3.size)
        + tile_b * H2 * 4 + tile_b * H1 * 4                         # activations
        + 2 * tile_b * 4                                            # out x2
    )
    vmem_limit = int(min(48 * 1024 * 1024, max(32 * 1024 * 1024, 2 * vmem_need)))

    flops = 2 * b_pad * (D_in * H2 + H2 * H1 + H1)
    bytes_accessed = int(
        b_pad * D_in * 2                        # x (bf16)
        + w1.size * w1.dtype.itemsize           # bf16 weights
        + w2.size * w2.dtype.itemsize
        + (b1.size + b2.size + w3.size + b3.size) * 4
        + b_pad * 4                             # output
    )

    out = pl.pallas_call(
        _mlp_kernel,
        out_shape=jax.ShapeDtypeStruct((b_pad, 1), jnp.float32),
        grid_spec=pltpu.PrefetchScalarGridSpec(
            num_scalar_prefetch=0,
            grid=grid,
            in_specs=[
                pl.BlockSpec((tile_b, D_in), lambda i: (i, 0)),   # x tile (bf16)
                pl.BlockSpec((D_in, H2), lambda i: (0, 0)),       # W1 (resident)
                pl.BlockSpec((1, H2), lambda i: (0, 0)),          # b1'
                pl.BlockSpec((H2, H1), lambda i: (0, 0)),         # W2 (resident)
                pl.BlockSpec((1, H1), lambda i: (0, 0)),          # b2'
                pl.BlockSpec((1, H1), lambda i: (0, 0)),          # w3 row
                pl.BlockSpec((1, 1), lambda i: (0, 0)),           # b3
            ],
            out_specs=pl.BlockSpec((tile_b, 1), lambda i: (i, 0)),
        ),
        compiler_params=pltpu.CompilerParams(
            dimension_semantics=_dimension_semantics(),
            vmem_limit_bytes=vmem_limit,
        ),
        cost_estimate=pl.CostEstimate(
            flops=flops, transcendentals=0, bytes_accessed=bytes_accessed),
    )(x, w1, b1, w2, b2, w3, b3)

    return out[:B]


def make_params(key, input_dim, hidden_size, hidden_size2, eps=1e-5):
    """Synthetic parameters matching the torch module's shapes, with BatchNorm
    (eval-mode running stats) and Linear biases folded into the weights."""
    ks = jax.random.split(key, 10)

    def lin(kw, kb, d_in, d_out):
        # torch.nn.Linear weight is [out, in]; we store transposed [in, out].
        bound = 1.0 / jnp.sqrt(d_in)
        w = jax.random.uniform(kw, (d_in, d_out), jnp.float32, -bound, bound)
        b = jax.random.uniform(kb, (1, d_out), jnp.float32, -bound, bound)
        return w, b

    def bn_fold(kg, kb, dim):
        gamma = 1.0 + 0.1 * jax.random.normal(kg, (1, dim), jnp.float32)
        beta = 0.1 * jax.random.normal(kb, (1, dim), jnp.float32)
        running_mean = jnp.zeros((1, dim), jnp.float32)
        running_var = jnp.ones((1, dim), jnp.float32)
        scale = gamma / jnp.sqrt(running_var + eps)
        shift = beta - running_mean * scale
        return scale, shift

    w1, b1 = lin(ks[0], ks[1], input_dim, hidden_size2)
    w2, b2 = lin(ks[2], ks[3], hidden_size2, hidden_size)
    w3, b3 = lin(ks[4], ks[5], hidden_size, 1)
    s1, t1 = bn_fold(ks[6], ks[7], hidden_size2)
    s2, t2 = bn_fold(ks[8], ks[9], hidden_size)

    # Fold BN affine into the preceding Linear, cast big weights to bf16.
    w1f = (w1 * s1).astype(jnp.bfloat16)
    b1f = (b1 * s1 + t1).astype(jnp.float32)
    w2f = (w2 * s2).astype(jnp.bfloat16)
    b2f = (b2 * s2 + t2).astype(jnp.float32)
    w3_row = w3.T.astype(jnp.float32)          # (1, H1) row for VPU reduce
    b3f = b3.astype(jnp.float32)               # (1, 1)

    return (w1f, b1f, w2f, b2f, w3_row, b3f)


def reference_forward(x, params):
    """Pure-JAX reference mirroring the kernel's numerics (bf16 matmul inputs,
    f32 accumulation, folded BN, eval-mode dropout=identity)."""
    w1, b1, w2, b2, w3, b3 = params
    xb = x.astype(jnp.bfloat16)
    h = jnp.dot(xb, w1, preferred_element_type=jnp.float32) + b1
    h = jnp.maximum(h, 0.0).astype(jnp.bfloat16)
    h = jnp.dot(h, w2, preferred_element_type=jnp.float32) + b2
    h = jnp.maximum(h, 0.0)
    return jnp.sum(h * w3, axis=-1, keepdims=True) + b3


if __name__ == "__main__":
    # Small, lane-aligned shapes (production sizes are 512/1024 hidden).
    batch = 777            # not a tile multiple -> exercises padding + 2-step grid
    input_dim = 128
    hidden_size = 128      # module default 512, scaled down (kept 128-aligned)
    hidden_size2 = 256     # module default 1024, scaled down (kept 128-aligned)

    key = jax.random.PRNGKey(0)
    kx, kp = jax.random.split(key)
    x = jax.random.normal(kx, (batch, input_dim), jnp.float32)
    params = make_params(kp, input_dim, hidden_size, hidden_size2)

    out = linear_probe_forward(x, params)
    out = jax.block_until_ready(out)

    ref = reference_forward(x, params)
    assert out.shape == (batch, 1)
    assert jnp.allclose(out, ref, atol=2e-3, rtol=2e-3), (
        float(jnp.max(jnp.abs(out - ref))))
    print("KERNEL_OK")
</pallas_src>

<mosaic_0001>
module attributes {stable_mosaic.version = 11 : i64} {
  func.func @_mlp_kernel(%arg0: i32, %arg1: memref<512x128xbf16, #tpu.memory_space<vmem>>, %arg2: memref<128x256xbf16, #tpu.memory_space<vmem>>, %arg3: memref<1x256xf32, #tpu.memory_space<vmem>>, %arg4: memref<256x128xbf16, #tpu.memory_space<vmem>>, %arg5: memref<1x128xf32, #tpu.memory_space<vmem>>, %arg6: memref<1x128xf32, #tpu.memory_space<vmem>>, %arg7: memref<1x1xf32, #tpu.memory_space<vmem>>, %arg8: memref<512x1xf32, #tpu.memory_space<vmem>>) attributes {dimension_semantics = [#tpu.dimension_semantics<parallel>], iteration_bounds = array<i64: 2>, scalar_prefetch = 0 : i64, scratch_operands = 0 : i64, tpu.core_type = #tpu.core_type<tc>, window_params = [{transform_indices = @transform_0, window_bounds = array<i64: 512, 128>}, {pipeline_mode = #tpu.pipeline_mode<synchronous>, transform_indices = @transform_1, window_bounds = array<i64: 128, 256>}, {pipeline_mode = #tpu.pipeline_mode<synchronous>, transform_indices = @transform_2, window_bounds = array<i64: 1, 256>}, {pipeline_mode = #tpu.pipeline_mode<synchronous>, transform_indices = @transform_3, window_bounds = array<i64: 256, 128>}, {pipeline_mode = #tpu.pipeline_mode<synchronous>, transform_indices = @transform_4, window_bounds = array<i64: 1, 128>}, {pipeline_mode = #tpu.pipeline_mode<synchronous>, transform_indices = @transform_5, window_bounds = array<i64: 1, 128>}, {pipeline_mode = #tpu.pipeline_mode<synchronous>, transform_indices = @transform_6, window_bounds = array<i64: 1, 1>}, {transform_indices = @transform_7, window_bounds = array<i64: 512, 1>}]} {
    %c0 = arith.constant 0 : index
    %c0_0 = arith.constant 0 : index
    %0 = vector.load %arg1[%c0, %c0_0] : memref<512x128xbf16, #tpu.memory_space<vmem>>, vector<512x128xbf16>
    %c0_1 = arith.constant 0 : index
    %c0_2 = arith.constant 0 : index
    %1 = vector.load %arg2[%c0_1, %c0_2] : memref<128x256xbf16, #tpu.memory_space<vmem>>, vector<128x256xbf16>
    %cst = arith.constant dense<0.000000e+00> : vector<512x256xf32>
    %2 = tpu.matmul %0, %1, %cst {dimension_numbers = #tpu.dot_dimension_numbers<[1], [0], [0], [1], [0, 0, 1, 1], [], []>} : vector<512x128xbf16>, vector<128x256xbf16>, vector<512x256xf32> -> vector<512x256xf32>
    %c0_3 = arith.constant 0 : index
    %c0_4 = arith.constant 0 : index
    %3 = vector.load %arg3[%c0_3, %c0_4] : memref<1x256xf32, #tpu.memory_space<vmem>>, vector<1x256xf32>
    %4 = vector.broadcast %3 : vector<1x256xf32> to vector<512x256xf32>
    %5 = arith.addf %2, %4 : vector<512x256xf32>
    %cst_5 = arith.constant 0.000000e+00 : f32
    %6 = vector.broadcast %cst_5 : f32 to vector<512x256xf32>
    %7 = arith.maximumf %5, %6 : vector<512x256xf32>
    %8 = arith.truncf %7 : vector<512x256xf32> to vector<512x256xbf16>
    %c0_6 = arith.constant 0 : index
    %c0_7 = arith.constant 0 : index
    %9 = vector.load %arg4[%c0_6, %c0_7] : memref<256x128xbf16, #tpu.memory_space<vmem>>, vector<256x128xbf16>
    %cst_8 = arith.constant dense<0.000000e+00> : vector<512x128xf32>
    %10 = tpu.matmul %8, %9, %cst_8 {dimension_numbers = #tpu.dot_dimension_numbers<[1], [0], [0], [1], [0, 0, 1, 1], [], []>} : vector<512x256xbf16>, vector<256x128xbf16>, vector<512x128xf32> -> vector<512x128xf32>
    %c0_9 = arith.constant 0 : index
    %c0_10 = arith.constant 0 : index
    %11 = vector.load %arg5[%c0_9, %c0_10] : memref<1x128xf32, #tpu.memory_space<vmem>>, vector<1x128xf32>
    %12 = vector.broadcast %11 : vector<1x128xf32> to vector<512x128xf32>
    %13 = arith.addf %10, %12 : vector<512x128xf32>
    %cst_11 = arith.constant 0.000000e+00 : f32
    %14 = vector.broadcast %cst_11 : f32 to vector<512x128xf32>
    %15 = arith.maximumf %13, %14 : vector<512x128xf32>
    %c0_12 = arith.constant 0 : index
    %c0_13 = arith.constant 0 : index
    %16 = vector.load %arg6[%c0_12, %c0_13] : memref<1x128xf32, #tpu.memory_space<vmem>>, vector<1x128xf32>
    %17 = vector.broadcast %16 : vector<1x128xf32> to vector<512x128xf32>
    %18 = arith.mulf %15, %17 : vector<512x128xf32>
    %cst_14 = arith.constant dense<0.000000e+00> : vector<512xf32>
    %19 = vector.multi_reduction <add>, %18, %cst_14 [1] : vector<512x128xf32> to vector<512xf32>
    %20 = vector.shape_cast %19 : vector<512xf32> to vector<512x1xf32>
    %c0_15 = arith.constant 0 : index
    %c0_16 = arith.constant 0 : index
    %21 = vector.load %arg7[%c0_15, %c0_16] : memref<1x1xf32, #tpu.memory_space<vmem>>, vector<1x1xf32>
    %22 = vector.broadcast %21 : vector<1x1xf32> to vector<512x1xf32>
    %23 = arith.addf %20, %22 : vector<512x1xf32>
    %c0_17 = arith.constant 0 : index
    %c0_18 = arith.constant 0 : index
    %24 = vector.load %arg8[%c0_17, %c0_18] : memref<512x1xf32, #tpu.memory_space<vmem>>, vector<512x1xf32>
    tpu.vector_store %arg8[%c0_17, %c0_18], %23 {strides = array<i32>} : memref<512x1xf32, #tpu.memory_space<vmem>>, vector<512x1xf32>,
    return
  }
  func.func @transform_0(%arg0: i32) -> (i32, i32) {
    %c0_i32 = arith.constant 0 : i32
    %c0_i32_0 = arith.constant 0 : i32
    return %arg0, %c0_i32 : i32, i32
  }
  func.func @transform_1(%arg0: i32) -> (i32, i32) {
    %c0_i32 = arith.constant 0 : i32
    %c0_i32_0 = arith.constant 0 : i32
    %c0_i32_1 = arith.constant 0 : i32
    return %c0_i32, %c0_i32_0 : i32, i32
  }
  func.func @transform_2(%arg0: i32) -> (i32, i32) {
    %c0_i32 = arith.constant 0 : i32
    %c0_i32_0 = arith.constant 0 : i32
    %c0_i32_1 = arith.constant 0 : i32
    return %c0_i32, %c0_i32_0 : i32, i32
  }
  func.func @transform_3(%arg0: i32) -> (i32, i32) {
    %c0_i32 = arith.constant 0 : i32
    %c0_i32_0 = arith.constant 0 : i32
    %c0_i32_1 = arith.constant 0 : i32
    return %c0_i32, %c0_i32_0 : i32, i32
  }
  func.func @transform_4(%arg0: i32) -> (i32, i32) {
    %c0_i32 = arith.constant 0 : i32
    %c0_i32_0 = arith.constant 0 : i32
    %c0_i32_1 = arith.constant 0 : i32
    return %c0_i32, %c0_i32_0 : i32, i32
  }
  func.func @transform_5(%arg0: i32) -> (i32, i32) {
    %c0_i32 = arith.constant 0 : i32
    %c0_i32_0 = arith.constant 0 : i32
    %c0_i32_1 = arith.constant 0 : i32
    return %c0_i32, %c0_i32_0 : i32, i32
  }
  func.func @transform_6(%arg0: i32) -> (i32, i32) {
    %c0_i32 = arith.constant 0 : i32
    %c0_i32_0 = arith.constant 0 : i32
    %c0_i32_1 = arith.constant 0 : i32
    return %c0_i32, %c0_i32_0 : i32, i32
  }
  func.func @transform_7(%arg0: i32) -> (i32, i32) {
    %c0_i32 = arith.constant 0 : i32
    %c0_i32_0 = arith.constant 0 : i32
    return %arg0, %c0_i32 : i32, i32
  }
}

</mosaic_0001>

<bundles_post_ra>
// kernel: tpu_custom_call.1
= control target key start
LH: loop header
LB: loop body
LE: loop exit
PB: predicated region body
PF: predicated region fallthrough
CT: control target
= control target key end

     0   :  { %s3313_s0 = inlined_call_operand.hbm [shape: bf16[1024,128], index: 0, kind: input, shape index: {}]   ;;  %s3314_s1 = inlined_call_operand.hbm [shape: bf16[128,256], index: 1, kind: input, shape index: {}]   ;;  %s3315_s2 = inlined_call_operand.vmem [shape: f32[1,256], index: 2, kind: input, shape index: {}]   ;;  %s3316_s3 = inlined_call_operand.hbm [shape: bf16[256,128], index: 3, kind: input, shape index: {}]   ;;  %s3317_s4 = inlined_call_operand.vmem [shape: f32[1,128], index: 4, kind: input, shape index: {}]   ;;  %s3318_s5 = inlined_call_operand.vmem [shape: f32[1,128], index: 5, kind: input, shape index: {}]   ;;  %s3319_s6 = inlined_call_operand.<no memory space> [shape: f32[1,1], index: 6, kind: input, shape index: {}]   ;;  %s3320_s7 = inlined_call_operand.vmem [shape: f32[1024,1], index: 7, kind: output, shape index: {}]  }
   0x1   :  { %v12_v0 = vstv %s3319_s6 }
   0x2   :  { %13 = vst [vmem:[#allocation2] sm:$0x1] %v12_v0 }
   0x3   :  { %14 = vsyncpa [#allocation4], 0 }
   0x4   :  { %16 = vsyncpa [#allocation4 + $0x1], 0 }
   0x5   :  { %17 = vsyncpa [#allocation6], 0  ;;  %s2578_s26 = smov 0   ;;  %s2580_s27 = smov 0  }
   0x6   :  { %s2582_s28 = smov 0   ;;  %s2584_s29 = smov 0  }
   0x7 LB: > { %s2151_s6 = sadd.s32 4294967295, %s2525_s29   ;;  %p43_p0 = scmp.ne.s32.totalorder %s2517_s27, %s2513_s26  ;;  %s2525_s29 = sphi %s2584_s29, %s3336_s29   ;;  %s2521_s28 = sphi %s2582_s28, %s3335_s28   ;;  %s2517_s27 = sphi %s2580_s27, %s3334_s27   ;;  %s2513_s26 = sphi %s2578_s26, %s3333_s26  }
   0x8   : > { %p2600_p1 = scmp.eq.s32.totalorder %s2151_s6, 0  ;;  %p2153_p2 = scmp.ge.s32.totalorder %s2525_s29, 1 }
   0x9   : > { %p206_p3 = scmp.lt.s32.totalorder %s2525_s29, 3  ;;  %s2527_s10 = smov [#allocation5]  }
   0xa   : > { %s3325_s30 = scalar_select %p2600_p1, 1, 0 }
   0xb   : > { %p2608_p4 = por %p2600_p1, %p43_p0  ;;  %p2612_p5 = pnand %p2153_p2, %p206_p3 }
   0xc   : > { %s218_s11 = sshll.u32 %s2527_s10, 4  ;;  %s2528_s13 = smov [#allocation7]   ;;  %s219_s11 = int_to_ptr.vmem [resolvable:$true] %s218_s11 }
   0xd   : > { %s3326_s8 = scalar_select %p2608_p4, 1, 0 }
   0xe   : > { %s3327_s9 = scalar_select %p2612_p5, 1, 0 }
   0xf   : > { %p2278_p6 = pneg %p2612_p5  ;;  %s234_s14 = sshll.u32 %s2528_s13, 4  ;;  %s235_s14 = int_to_ptr.vmem [resolvable:$true] %s234_s14 }
  0x10   : > { %s2418_s15 = scalar_lea.vmem %s219_s11, 2048  ;;  %p2426_p12 = scmp.lt.s32.totalorder %s219_s11, %s219_s11 }
  0x11   : > { %p2620_p7 = pnand %p2278_p6, %p2600_p1  ;;  %p2419_p9 = scmp.ne.s32.totalorder %s219_s11, %s2418_s15 }
  0x12   : > { %p2427_p13 = scmp.lt.s32.totalorder %s2418_s15, %s2418_s15 }
  0x13   : > { %p2409_p8 = pneg %p2620_p7 }
  0x14   : > { %p2428_p0 = por %p2427_p13, %p2426_p12 }
  0x15   : > { %p2421_p10 = pnand %p2419_p9, %p2409_p8 }
  0x17   : > { %p2422_p11 = pneg %p2421_p10 }
  0x19   : > { %p2429_p2 = pnand %p2428_p0, %p2422_p11 }
  0x1b   : > { %2432 = shalt.err (!%p2429_p2)
}
  0x1c   : > { %s2529_s16 = smov 128   ;;  %s2530_s17 = smov 8  }
  0x1d   : > { %2281 = dma.hbm_to_vmem [thread:$0]  (!%p2620_p7), %s3314_s1, 2048, %s219_s11, [#allocation6], %s2529_s16, %s2529_s16, %s2530_s17  }
  0x1e   : > { %s2444_s20 = scalar_lea.vmem %s235_s14, 2048  ;;  %p2452_p10 = scmp.lt.s32.totalorder %s235_s14, %s235_s14 }
  0x1f   : > { %p2445_p3 = scmp.ne.s32.totalorder %s235_s14, %s2444_s20  ;;  %p2453_p1 = scmp.lt.s32.totalorder %s2444_s20, %s2444_s20 }
  0x21   : > { %p2447_p6 = pnand %p2445_p3, %p2409_p8  ;;  %p2454_p12 = por %p2453_p1, %p2452_p10 }
  0x23   : > { %p2448_p9 = pneg %p2447_p6 }
  0x25   : > { %p2455_p11 = pnand %p2454_p12, %p2448_p9 }
  0x27   : > { %2458 = shalt.err (!%p2455_p11)
}
  0x28   : > { %s2531_s21 = smov 64   ;;  %s2532_s22 = smov 4  }
  0x29   : > { %2284 = dma.hbm_to_vmem [thread:$0]  (!%p2620_p7), %s3316_s3, 2048, %s235_s14, [#allocation6], %s2531_s21, %s2531_s21, %s2532_s22  }
  0x2a   : > { %s2646_s25 = sadd.s32 1, %s2525_s29   ;;  %s30_s10 = sadd.s32 1, %s2521_s28 }
  0x2b   : > { %s27_s26 = ssub.s32 %s2525_s29, %s2646_s25  ;;  %p37_p8 = scmp.ne.s32.totalorder %s2521_s28, %s2517_s27 }
  0x2c   : > { %p28_p1 = scmp.eq.s32.totalorder %s27_s26, 0  ;;  %p38_p13 = scmp.eq.s32.totalorder %s2525_s29, 0 }
  0x2d   : > { %p2291_p2 = scmp.lt.s32.totalorder %s2525_s29, 2  ;;  %s257_s12 = sand.u32 1, %s2521_s28  }
  0x2e   : > { %s2655_s11 = scalar_select %p28_p1, %s2521_s28, %s30_s10  }
  0x2f   : > { %p39_p0 = por %p38_p13, %p37_p8  ;;  %s2235_s13 = sshll.u32 %s2525_s29, 12 }
  0x30   : > { %s2157_s15 = sshll.u32 %s257_s12, 8  ;;  %s2663_s18 = scalar_lea.hbm %s3313_s0, %s2235_s13 }
  0x31   : > { %s261_s14 = scalar_lea.vmem [#allocation3], %s2157_s15  ;;  %p2665_p7 = pnand %p2291_p2, %p39_p0 }
  0x32   : > { %s268_s19 = sshll.u32 %s261_s14, 4  ;;  %s2671_s23 = scalar_lea.sflag [#allocation4], %s257_s12  ;;  %s2669_s19 = int_to_ptr.vmem [resolvable:$true] %s268_s19 }
  0x33   : > { %s2459_s24 = scalar_lea.hbm %s2663_s18, 4096  ;;  %p2461_p6 = pneg %p2665_p7 }
  0x34   : > { %p2460_p3 = scmp.ne.s32.totalorder %s2663_s18, %s2459_s24  ;;  %s2464_s13 = scalar_lea.hbm %s3313_s0, 8192 }
  0x35   : > { %p2465_p12 = scmp.lt.s32.totalorder %s2663_s18, %s3313_s0  ;;  %p2466_p11 = scmp.lt.s32.totalorder %s2464_s13, %s2459_s24 }
  0x36   : > { %p2462_p9 = pnand %p2461_p6, %p2460_p3 }
  0x37   : > { %p2467_p1 = por %p2466_p11, %p2465_p12 }
  0x38   : > { %p2463_p10 = pneg %p2462_p9 }
  0x3a   : > { %p2468_p8 = pnand %p2467_p1, %p2463_p10 }
  0x3c   : > { %2471 = shalt.err (!%p2468_p8)
}
  0x3d   : > { %s2472_s12 = scalar_lea.vmem %s2669_s19, 4096  ;;  %s2533_s17 = smov [#allocation3]  }
  0x3e   : > { %p2473_p13 = scmp.ne.s32.totalorder %s2669_s19, %s2472_s12  ;;  %s2477_s14 = sshll.u32 %s2533_s17, 4  ;;  %s2478_s14 = int_to_ptr.vmem [resolvable:$false] %s2477_s14 }
  0x3f   : > { %s2479_s26 = scalar_lea.vmem %s2478_s14, 8192  ;;  %p2480_p3 = scmp.lt.s32.totalorder %s2669_s19, %s2478_s14 }
  0x40   : > { %p2475_p0 = pnand %p2473_p13, %p2461_p6  ;;  %p2481_p9 = scmp.lt.s32.totalorder %s2479_s26, %s2472_s12 }
  0x42   : > { %p2476_p2 = pneg %p2475_p0  ;;  %p2482_p4 = por %p2481_p9, %p2480_p3 }
  0x44   : > { %p2483_p5 = pnand %p2482_p4, %p2476_p2 }
  0x46   : > { %2486 = shalt.err (!%p2483_p5)
}
  0x47   : > { %2288 = dma.hbm_to_vmem [thread:$0]  (!%p2665_p7), %s2663_s18, 4096, %s2669_s19, %s2671_s23, %s2531_s21, %s2531_s21, %s2532_s22  }
  0x48   : > { %p3330_p6 = scmp.ne.s32.totalorder %s3327_s9, 0 }
  0x49   : > { %s282_s24 = sand.u32 (!%p3330_p6), 1, %s2517_s27   ;;  %p3331_p4 = scmp.ne.s32.totalorder (!%p3330_p6), %s3326_s8, 0 }
  0x4a   : > { %280 = sbr.rel (%p3330_p6) target bundleno = 915 (0x393), region = 48  ;;  %s2161_s10 = sshll.u32 (!%p3330_p6), %s282_s24, 8 }
  0x4b   : > { %s283_s13 = scalar_lea.sflag (!%p3330_p6), [#allocation4], %s282_s24  ;;  %s2698_s15 = scalar_lea.vmem (!%p3330_p6), [#allocation3], %s2161_s10 }
  0x4f   : > { %2504 = dma.done.wait (%p3331_p4), %s283_s13, 4096  }
  0x50   : > { %2506 = vsyncadd (%p3331_p4), %s283_s13, 4294963200  ;;  %p3332_p5 = scmp.ne.s32.totalorder %s3325_s30, 0 }
  0x52   : > { %2508 = dma.done.wait (%p3332_p5), [#allocation6], 4096  }
  0x53   : > { %2510 = vsyncadd (%p3332_p5), [#allocation6], 4294963200  ;;  %v2534_v1 = vmov 0   ;;  %v2333_v2 = vld [vmem:[#allocation5 + $0x74] ss:$8 sps:$4 sm:$0xff]   ;;  %v2375_v20 = vld [vmem:[#allocation7 + $0x28] sm:$0xff]   ;;  %v415_v0 = vlaneseq }
  0x54   : > { %729 = vmatprep.mubr.bf16.mxu0 %v2534_v1  ;;  %2236 = vmatprep.subr.bf16.mxu1 %v2534_v1  ;;  %v2335_v3 = vld [vmem:[#allocation5 + $0x70] ss:$8 sps:$4 sm:$0xff]   ;;  %v2336_v4 = vld [vmem:[#allocation5 + $0x64] ss:$8 sps:$4 sm:$0xff]   ;;  %v2338_v5 = vld [vmem:[#allocation5 + $0x60] ss:$8 sps:$4 sm:$0xff]  }
  0x55   : > { %697 = vmatprep.subr.bf16.mxu0 %v2333_v2  ;;  %v2339_v6 = vld [vmem:[#allocation5 + $0x54] ss:$8 sps:$4 sm:$0xff]   ;;  %v2341_v7 = vld [vmem:[#allocation5 + $0x50] ss:$8 sps:$4 sm:$0xff]   ;;  %v2342_v8 = vld [vmem:[#allocation5 + $0x44] ss:$8 sps:$4 sm:$0xff]  }
  0x56   : > { %698 = vmatpush1.bf16.msra.mxu0 %v2335_v3  ;;  %v2344_v9 = vld [vmem:[#allocation5 + $0x40] ss:$8 sps:$4 sm:$0xff]   ;;  %v2345_v10 = vld [vmem:[#allocation5 + $0x34] ss:$8 sps:$4 sm:$0xff]   ;;  %v2347_v11 = vld [vmem:[#allocation5 + $0x30] ss:$8 sps:$4 sm:$0xff]  }
  0x57   : > { %699 = vmatprep.subr.bf16.mxu0 %v2336_v4  ;;  %v2348_v12 = vld [vmem:[#allocation5 + $0x24] ss:$8 sps:$4 sm:$0xff]   ;;  %v2350_v13 = vld [vmem:[#allocation5 + $0x20] ss:$8 sps:$4 sm:$0xff]   ;;  %v2351_v14 = vld [vmem:[#allocation5 + $0x14] ss:$8 sps:$4 sm:$0xff]  }
  0x58   : > { %v2353_v15 = vld [vmem:[#allocation5 + $0x10] ss:$8 sps:$4 sm:$0xff]   ;;  %v2354_v17 = vld [vmem:[#allocation5 + $0x4] ss:$8 sps:$4 sm:$0xff]   ;;  %v2356_v19 = vld [vmem:[#allocation5] ss:$8 sps:$4 sm:$0xff]  }
  0x59   : > { %v2369_v16 = vld [vmem:[#allocation7 + $0x38] sm:$0xff]   ;;  %v2372_v18 = vld [vmem:[#allocation7 + $0x30] sm:$0xff]   ;;  %v2357_v21 = vld [vmem:[%s2698_s15] sm:$0xff]   ;;  %v416_v4 = vshrl.u32 %v415_v0, 7  ;;  %s2164_s19 = sshll.u32 %s2151_s6, 6  ;;  %vm2000_vm0 = vcmask 7168  }
  0x5a   : > { %700 = vmatpush1.bf16.msra.mxu0 %v2338_v5  ;;  %2252 = vmatpush1.bf16.msra.mxu1 %v2369_v16  ;;  %v2358_v22 = vld [vmem:[%s2698_s15 + $0x8] sm:$0xff]   ;;  %v2378_v23 = vld [vmem:[#allocation7 + $0x20] sm:$0xff]   ;;  %v2359_v24 = vld [vmem:[%s2698_s15 + $0x10] sm:$0xff]   ;;  %p327_p7 = scmp.lt.s32.totalorder %s2164_s19, 127 }
  0x5b   : > { %701 = vmatprep.subr.bf16.mxu0 %v2339_v6  ;;  %2237 = vmatprep.subr.bf16.mxu1 %v2534_v1  ;;  %v2360_v25 = vld [vmem:[%s2698_s15 + $0x18] sm:$0xff]   ;;  %v2361_v27 = vld [vmem:[%s2698_s15 + $0x20] sm:$0xff]   ;;  %v2362_v28 = vld [vmem:[%s2698_s15 + $0x28] sm:$0xff]  }
  0x5c   : > { %v2381_v26 = vld [vmem:[#allocation7 + $0x18] sm:$0xff]   ;;  %v2384_v29 = vld [vmem:[#allocation7 + $0x10] sm:$0xff]   ;;  %v2386_v31 = vld [vmem:[#allocation7 + $0x8] sm:$0xff]   ;;  %s3338_s19 = smov (!%p327_p7, %s2164_s19), 127 }
  0x5d   : > { %v2363_v30 = vld [vmem:[%s2698_s15 + $0x30] sm:$0xff]   ;;  %v2364_v32 = vld [vmem:[%s2698_s15 + $0x38] sm:$0xff]   ;;  %v2388_v33 = vld [vmem:[#allocation7] sm:$0xff]   ;;  %s2165_s29 = sshll.u32 %s3338_s19, 3 }
  0x5e   : > { %702 = vmatpush1.bf16.msra.mxu0 %v2341_v7  ;;  %2253 = vmatpush1.bf16.msra.mxu1 %v2372_v18  ;;  %v2389_v34 = vld [vmem:[#allocation7 + $0x78] sm:$0xff]   ;;  %v2365_v35 = vld [vmem:[%s2698_s15 + $0x40] sm:$0xff]   ;;  %v2391_v36 = vld [vmem:[#allocation7 + $0x70] sm:$0xff]   ;;  %s3060_s23 = scalar_lea.vmem %s3320_s7, %s2165_s29 }
  0x5f   : > { %703 = vmatprep.subr.bf16.mxu0 %v2342_v8  ;;  %2238 = vmatprep.subr.bf16.mxu1 %v2534_v1  ;;  %v2366_v37 = vld [vmem:[%s2698_s15 + $0x48] sm:$0xff]   ;;  %v2394_v39 = vld [vmem:[#allocation7 + $0x60] sm:$0xff]   ;;  %v2367_v40 = vld [vmem:[%s2698_s15 + $0x50] sm:$0xff]   ;;  %v417_v8 = vsub.s32 0, %v416_v4 }
  0x60   : > { %v2392_v38 = vld [vmem:[#allocation7 + $0x68] sm:$0xff]   ;;  %v2395_v41 = vld [vmem:[#allocation7 + $0x58] sm:$0xff]   ;;  %v2397_v42 = vld [vmem:[#allocation7 + $0x50] sm:$0xff]  }
  0x61   : > { %v2368_v43 = vld [vmem:[%s2698_s15 + $0x58] sm:$0xff]   ;;  %v2398_v44 = vld [vmem:[#allocation7 + $0x48] sm:$0xff]   ;;  %v2400_v45 = vld [vmem:[#allocation7 + $0x40] sm:$0xff]  }
  0x62   : > { %704 = vmatpush1.bf16.msra.mxu0 %v2344_v9  ;;  %2254 = vmatpush1.bf16.msra.mxu1 %v2375_v20  ;;  %v2370_v46 = vld [vmem:[%s2698_s15 + $0x60] sm:$0xff]   ;;  %v2371_v47 = vld [vmem:[%s2698_s15 + $0x68] sm:$0xff]   ;;  %v2373_v48 = vld [vmem:[%s2698_s15 + $0x70] sm:$0xff]   ;;  %v421_v9 = vsub.s32 1, %v416_v4 }
  0x63   : > { %705 = vmatprep.subr.bf16.mxu0 %v2345_v10  ;;  %2239 = vmatprep.subr.bf16.mxu1 %v2534_v1  ;;  %v2374_v49 = vld [vmem:[%s2698_s15 + $0x78] sm:$0xff]   ;;  %v2376_v50 = vld [vmem:[%s2698_s15 + $0x80] sm:$0xff]   ;;  %v2377_v51 = vld [vmem:[%s2698_s15 + $0x88] sm:$0xff]  }
  0x64   : > { %v2379_v52 = vld [vmem:[%s2698_s15 + $0x90] sm:$0xff]   ;;  %v2380_v53 = vld [vmem:[%s2698_s15 + $0x98] sm:$0xff]   ;;  %v2382_v54 = vld [vmem:[%s2698_s15 + $0xa0] sm:$0xff]  }
  0x65   : > { %v2383_v55 = vld [vmem:[%s2698_s15 + $0xa8] sm:$0xff]   ;;  %v2385_v56 = vld [vmem:[%s2698_s15 + $0xb0] sm:$0xff]   ;;  %v2387_v57 = vld [vmem:[%s2698_s15 + $0xb8] sm:$0xff]  }
  0x66   : > { %706 = vmatpush1.bf16.msra.mxu0 %v2347_v11  ;;  %2255 = vmatpush1.bf16.msra.mxu1 %v2378_v23  ;;  %v2390_v58 = vld [vmem:[%s2698_s15 + $0xc0] sm:$0xff]   ;;  %v2393_v62 = vld [vmem:[%s2698_s15 + $0xc8] sm:$0xff]   ;;  %v2396_v6 = vld [vmem:[%s2698_s15 + $0xd0] sm:$0xff]  }
  0x67   : > { %707 = vmatprep.subr.bf16.mxu0 %v2348_v12  ;;  %2240 = vmatprep.subr.bf16.mxu1 %v2534_v1  ;;  %v413_v10 = vld [vmem:[%s3315_s2] sm:$0x3]  ;;  %v2403_v4 = vld [vmem:[%s2698_s15 + $0xf0] sm:$0xff]  }
  0x6a   : > { %708 = vmatpush1.bf16.msra.mxu0 %v2350_v13  ;;  %2256 = vmatpush1.bf16.msra.mxu1 %v2381_v26  ;;  %v2814_v13 = vrot.slane %v413_v10, %v417_v8 }
  0x6b   : > { %709 = vmatprep.subr.bf16.mxu0 %v2351_v14  ;;  %2241 = vmatprep.subr.bf16.mxu1 %v2534_v1  ;;  %v2816_v14 = vrot.slane %v413_v10, %v421_v9 }
  0x6e   : > { %710 = vmatpush1.bf16.msra.mxu0 %v2353_v15  ;;  %2257 = vmatpush1.bf16.msra.mxu1 %v2384_v29 }
  0x6f   : > { %711 = vmatprep.subr.bf16.mxu0 %v2354_v17  ;;  %2242 = vmatprep.subr.bf16.mxu1 %v2534_v1 }
  0x72   : > { %712 = vmatpush1.bf16.msra.mxu0 %v2356_v19  ;;  %2258 = vmatpush1.bf16.msra.mxu1 %v2386_v31 }
  0x73   : > { %1377 = vmatprep.subr.bf16.mxu0 %v2534_v1  ;;  %2243 = vmatprep.subr.bf16.mxu1 %v2534_v1 }
  0x75   : > { %730 = vmatmul.mubr.bf16.vlgmr.msra.gmra.mxu0 %v2357_v21 }
  0x76   : > { %739 = vmatprep.mubr.bf16.mxu0 %v2534_v1  ;;  %1378 = vmatpush1.bf16.msra.mxu0 %v2369_v16  ;;  %v2399_v16 = vld [vmem:[%s2698_s15 + $0xd8] sm:$0xff]  }
  0x77   : > { %1379 = vmatprep.subr.bf16.mxu0 %v2534_v1  ;;  %2259 = vmatpush1.bf16.msra.mxu1 %v2388_v33 }
  0x78   : > { %2244 = vmatprep.subr.bf16.mxu1 %v2534_v1 }
  0x7a   : > { %1380 = vmatpush1.bf16.msra.mxu0 %v2372_v18 }
  0x7b   : > { %1381 = vmatprep.subr.bf16.mxu0 %v2534_v1  ;;  %2260 = vmatpush2.bf16.msra.mxu1 %v2389_v34 }
  0x7c   : > { %2245 = vmatprep.subr.bf16.mxu1 %v2534_v1 }
  0x7d   : > { %740 = vmatmul.mubr.bf16.gmra.mxu0 %v2358_v22 }
  0x7e   : > { %749 = vmatprep.mubr.bf16.mxu0 %v2534_v1  ;;  %1382 = vmatpush1.bf16.msra.mxu0 %v2375_v20 }
  0x7f   : > { %1383 = vmatprep.subr.bf16.mxu0 %v2534_v1  ;;  %2261 = vmatpush2.bf16.msra.mxu1 %v2391_v36 }
  0x80   : > { %2246 = vmatprep.subr.bf16.mxu1 %v2534_v1 }
  0x82   : > { %1384 = vmatpush1.bf16.msra.mxu0 %v2378_v23 }
  0x83   : > { %1385 = vmatprep.subr.bf16.mxu0 %v2534_v1  ;;  %2262 = vmatpush2.bf16.msra.mxu1 %v2392_v38 }
  0x84   : > { %2247 = vmatprep.subr.bf16.mxu1 %v2534_v1 }
  0x85   : > { %750 = vmatmul.mubr.bf16.gmra.mxu0 %v2359_v24 }
  0x86   : > { %759 = vmatprep.mubr.bf16.mxu0 %v2534_v1  ;;  %1386 = vmatpush1.bf16.msra.mxu0 %v2381_v26 }
  0x87   : > { %1387 = vmatprep.subr.bf16.mxu0 %v2534_v1  ;;  %2263 = vmatpush2.bf16.msra.mxu1 %v2394_v39 }
  0x88   : > { %2248 = vmatprep.subr.bf16.mxu1 %v2534_v1 }
  0x8a   : > { %1388 = vmatpush1.bf16.msra.mxu0 %v2384_v29 }
  0x8b   : > { %1389 = vmatprep.subr.bf16.mxu0 %v2534_v1  ;;  %2264 = vmatpush2.bf16.msra.mxu1 %v2395_v41 }
  0x8c   : > { %2249 = vmatprep.subr.bf16.mxu1 %v2534_v1 }
  0x8d   : > { %760 = vmatmul.mubr.bf16.gmra.mxu0 %v2360_v25 }
  0x8e   : > { %769 = vmatprep.mubr.bf16.mxu0 %v2534_v1  ;;  %1390 = vmatpush1.bf16.msra.mxu0 %v2386_v31  ;;  %v2401_v31 = vld [vmem:[%s2698_s15 + $0xe0] sm:$0xff]  }
  0x8f   : > { %1391 = vmatprep.subr.bf16.mxu0 %v2534_v1  ;;  %2265 = vmatpush2.bf16.msra.mxu1 %v2397_v42 }
  0x90   : > { %2250 = vmatprep.subr.bf16.mxu1 %v2534_v1 }
  0x92   : > { %1392 = vmatpush1.bf16.msra.mxu0 %v2388_v33 }
  0x93   : > { %1393 = vmatprep.subr.bf16.mxu0 %v2534_v1  ;;  %2266 = vmatpush2.bf16.msra.mxu1 %v2398_v44 }
  0x94   : > { %2251 = vmatprep.subr.bf16.mxu1 %v2534_v1 }
  0x95   : > { %770 = vmatmul.mubr.bf16.gmra.mxu0 %v2361_v27 }
  0x96   : > { %779 = vmatprep.mubr.bf16.mxu0 %v2534_v1  ;;  %1394 = vmatpush2.bf16.msra.mxu0 %v2389_v34 }
  0x97   : > { %1395 = vmatprep.subr.bf16.mxu0 %v2534_v1  ;;  %2267 = vmatpush2.bf16.msra.mxu1 %v2400_v45 }
  0x9a   : > { %1396 = vmatpush2.bf16.msra.mxu0 %v2391_v36 }
  0x9b   : > { %1397 = vmatprep.subr.bf16.mxu0 %v2534_v1 }
  0x9d   : > { %780 = vmatmul.mubr.bf16.gmra.mxu0 %v2362_v28 }
  0x9e   : > { %789 = vmatprep.mubr.bf16.mxu0 %v2534_v1  ;;  %1398 = vmatpush2.bf16.msra.mxu0 %v2392_v38 }
  0x9f   : > { %1399 = vmatprep.subr.bf16.mxu0 %v2534_v1 }
  0xa2   : > { %1400 = vmatpush2.bf16.msra.mxu0 %v2394_v39 }
  0xa3   : > { %1401 = vmatprep.subr.bf16.mxu0 %v2534_v1 }
  0xa5   : > { %790 = vmatmul.mubr.bf16.gmra.mxu0 %v2363_v30 }
  0xa6   : > { %799 = vmatprep.mubr.bf16.mxu0 %v2534_v1  ;;  %1402 = vmatpush2.bf16.msra.mxu0 %v2395_v41 }
  0xa7   : > { %1403 = vmatprep.subr.bf16.mxu0 %v2534_v1 }
  0xaa   : > { %1404 = vmatpush2.bf16.msra.mxu0 %v2397_v42 }
  0xab   : > { %1405 = vmatprep.subr.bf16.mxu0 %v2534_v1 }
  0xad   : > { %800 = vmatmul.mubr.bf16.gmra.mxu0 %v2364_v32 }
  0xae   : > { %809 = vmatprep.mubr.bf16.mxu0 %v2534_v1  ;;  %1406 = vmatpush2.bf16.msra.mxu0 %v2398_v44 }
  0xaf   : > { %1407 = vmatprep.subr.bf16.mxu0 %v2534_v1 }
  0xb2   : > { %1408 = vmatpush2.bf16.msra.mxu0 %v2400_v45 }
  0xb5   : > { %810 = vmatmul.mubr.bf16.gmra.mxu0 %v2365_v35 }
  0xb6   : > { %819 = vmatprep.mubr.bf16.mxu0 %v2534_v1 }
  0xbd   : > { %820 = vmatmul.mubr.bf16.gmra.mxu0 %v2366_v37 }
  0xbe   : > { %829 = vmatprep.mubr.bf16.mxu0 %v2534_v1 }
  0xc5   : > { %830 = vmatmul.mubr.bf16.gmra.mxu0 %v2367_v40 }
  0xc6   : > { %839 = vmatprep.mubr.bf16.mxu0 %v2534_v1 }
  0xcd   : > { %840 = vmatmul.mubr.bf16.gmra.mxu0 %v2368_v43 }
  0xce   : > { %849 = vmatprep.mubr.bf16.mxu0 %v2534_v1 }
  0xd5   : > { %850 = vmatmul.mubr.bf16.gmra.mxu0 %v2370_v46  ;;  %v2402_v46 = vld [vmem:[%s2698_s15 + $0xe8] sm:$0xff]  }
  0xd6   : > { %859 = vmatprep.mubr.bf16.mxu0 %v2534_v1 }
  0xdd   : > { %860 = vmatmul.mubr.bf16.gmra.mxu0 %v2371_v47 }
  0xde   : > { %869 = vmatprep.mubr.bf16.mxu0 %v2534_v1 }
  0xe5   : > { %870 = vmatmul.mubr.bf16.gmra.mxu0 %v2373_v48 }
  0xe6   : > { %879 = vmatprep.mubr.bf16.mxu0 %v2534_v1 }
  0xed   : > { %880 = vmatmul.mubr.bf16.gmra.mxu0 %v2374_v49 }
  0xee   : > { %889 = vmatprep.mubr.bf16.mxu0 %v2534_v1 }
  0xf5   : > { %890 = vmatmul.mubr.bf16.gmra.mxu0 %v2376_v50 }
  0xf6   : > { %899 = vmatprep.mubr.bf16.mxu0 %v2534_v1 }
  0xfd   : > { %900 = vmatmul.mubr.bf16.gmra.mxu0 %v2377_v51 }
  0xfe   : > { %909 = vmatprep.mubr.bf16.mxu0 %v2534_v1 }
 0x105   : > { %910 = vmatmul.mubr.bf16.gmra.mxu0 %v2379_v52 }
 0x106   : > { %919 = vmatprep.mubr.bf16.mxu0 %v2534_v1 }
 0x10d   : > { %920 = vmatmul.mubr.bf16.gmra.mxu0 %v2380_v53 }
 0x10e   : > { %929 = vmatprep.mubr.bf16.mxu0 %v2534_v1 }
 0x115   : > { %930 = vmatmul.mubr.bf16.gmra.mxu0 %v2382_v54 }
 0x116   : > { %939 = vmatprep.mubr.bf16.mxu0 %v2534_v1 }
 0x11d   : > { %940 = vmatmul.mubr.bf16.gmra.mxu0 %v2383_v55 }
 0x11e   : > { %949 = vmatprep.mubr.bf16.mxu0 %v2534_v1 }
 0x125   : > { %950 = vmatmul.mubr.bf16.gmra.mxu0 %v2385_v56 }
 0x126   : > { %959 = vmatprep.mubr.bf16.mxu0 %v2534_v1 }
 0x12d   : > { %960 = vmatmul.mubr.bf16.gmra.mxu0 %v2387_v57 }
 0x12e   : > { %969 = vmatprep.mubr.bf16.mxu0 %v2534_v1 }
 0x135   : > { %v2790_v59 = vpop.f32.mrf.mxu0  ;;  %970 = vmatmul.mubr.bf16.gmra.mxu0 %v2390_v58 }
 0x136   : > { %979 = vmatprep.mubr.bf16.mxu0 %v2534_v1 }
 0x137   : > { %v2793_v60 = vpop.f32.mrf.mxu0 }
 0x139   : > { %v2795_v61 = vpop.f32.mrf.mxu0 }
 0x13b   : > { %v2798_v63 = vpop.f32.mrf.mxu0 }
 0x13d   : > { %v2800_v2 = vpop.f32.mrf.mxu0  ;;  %980 = vmatmul.mubr.bf16.gmra.mxu0 %v2393_v62 }
 0x13e   : > { %989 = vmatprep.mubr.bf16.mxu0 %v2534_v1 }
 0x13f   : > { %v2803_v3 = vpop.f32.mrf.mxu0 }
 0x141   : > { %v2805_v5 = vpop.f32.mrf.mxu0 }
 0x143   : > { %v2808_v7 = vpop.f32.mrf.mxu0 }
 0x145   : > { %v751_v11 = vpop.f32.mrf.mxu0  ;;  %990 = vmatmul.mubr.bf16.gmra.mxu0 %v2396_v6 }
 0x146   : > { %999 = vmatprep.mubr.bf16.mxu0 %v2534_v1  ;;  %v752_v19 = vadd.f32 %v751_v11, %v2814_v13  ;;  %v738_v11 = vadd.f32 %v2798_v63, %v2816_v14 }
 0x147   : > { %v753_v12 = vpop.f32.mrf.mxu0 }
 0x148   : > { %v754_v17 = vadd.f32 %v753_v12, %v2816_v14  ;;  %v1058_v26 = vmax.f32 %v752_v19, 0.0 }
 0x149   : > { %v755_v15 = vpop.f32.mrf.mxu0 }
 0x14a   : > { %v756_v18 = vadd.f32 %v755_v15, %v2814_v13  ;;  %v1059_v24 = vmax.f32 %v754_v17, 0.0  ;;  %v734_v17 = vadd.f32 %v2793_v60, %v2816_v14  ;;  %v736_v60 = vadd.f32 %v2795_v61, %v2814_v13 }
 0x14b   : > { %v757_v20 = vpop.f32.mrf.mxu0 }
 0x14c   : > { %v758_v21 = vadd.f32 %v757_v20, %v2816_v14  ;;  %v1060_v22 = vmax.f32 %v756_v18, 0.0  ;;  %v1051_v63 = vmax.f32 %v734_v17, 0.0 }
 0x14d   : > { %v761_v23 = vpop.f32.mrf.mxu0  ;;  %1000 = vmatmul.mubr.bf16.gmra.mxu0 %v2399_v16 }
 0x14e   : > { %v1061_v25 = vmax.f32 %v758_v21, 0.0  ;;  %1009 = vmatprep.mubr.bf16.mxu0 %v2534_v1  ;;  %v1182_v29 = vpack.c.bf16 %v1060_v22, %v1058_v26  ;;  %v762_v34 = vadd.f32 %v761_v23, %v2814_v13  ;;  %v1053_v22 = vmax.f32 %v738_v11, 0.0  ;;  %v2404_v26 = vld [vmem:[%s2698_s15 + $0xf8] sm:$0xff]  }
 0x14f   : > { %v763_v27 = vpop.f32.mrf.mxu0 }
 0x150   : > { %v1183_v28 = vpack.c.bf16 %v1061_v25, %v1059_v24  ;;  %v764_v32 = vadd.f32 %v763_v27, %v2816_v14  ;;  %v1062_v41 = vmax.f32 %v762_v34, 0.0 }
 0x151   : > { %v765_v30 = vpop.f32.mrf.mxu0 }
 0x152   : > { %v766_v33 = vadd.f32 %v765_v30, %v2814_v13  ;;  %1425 = vmatprep.mubr.bf16.mxu1 %v1183_v28  ;;  %v1063_v39 = vmax.f32 %v764_v32, 0.0  ;;  %v1179_v32 = vpack.c.bf16 %v1053_v22, %v1051_v63 }
 0x153   : > { %v767_v35 = vpop.f32.mrf.mxu0  ;;  %1426 = vmatmul.mubr.bf16.vlgmr.msra.gmra.mxu1 %v1182_v29 }
 0x154   : > { %v768_v36 = vadd.f32 %v767_v35, %v2816_v14  ;;  %v1064_v37 = vmax.f32 %v766_v33, 0.0  ;;  %v732_v33 = vadd.f32 %v2790_v59, %v2814_v13 }
 0x155   : > { %v771_v38 = vpop.f32.mrf.mxu0  ;;  %1010 = vmatmul.mubr.bf16.gmra.mxu0 %v2401_v31 }
 0x156   : > { %v1065_v40 = vmax.f32 %v768_v36, 0.0  ;;  %1019 = vmatprep.mubr.bf16.mxu0 %v2534_v1  ;;  %v1184_v44 = vpack.c.bf16 %v1064_v37, %v1062_v41  ;;  %v772_v49 = vadd.f32 %v771_v38, %v2814_v13  ;;  %v744_v36 = vadd.f32 %v2803_v3, %v2816_v14 }
 0x157   : > { %v773_v42 = vpop.f32.mrf.mxu0  ;;  %v1052_v38 = vmax.f32 %v736_v60, 0.0  ;;  %v746_v3 = vadd.f32 %v2805_v5, %v2814_v13 }
 0x158   : > { %v1185_v43 = vpack.c.bf16 %v1065_v40, %v1063_v39  ;;  %v774_v47 = vadd.f32 %v773_v42, %v2816_v14  ;;  %v1066_v56 = vmax.f32 %v772_v49, 0.0  ;;  %v1050_v42 = vmax.f32 %v732_v33, 0.0 }
 0x159   : > { %v775_v45 = vpop.f32.mrf.mxu0 }
 0x15a   : > { %v776_v48 = vadd.f32 %v775_v45, %v2814_v13  ;;  %1433 = vmatprep.mubr.bf16.mxu1 %v1185_v43  ;;  %v1067_v54 = vmax.f32 %v774_v47, 0.0  ;;  %v1055_v45 = vmax.f32 %v744_v36, 0.0  ;;  %v1178_v47 = vpack.c.bf16 %v1052_v38, %v1050_v42 }
 0x15b   : > { %v777_v50 = vpop.f32.mrf.mxu0  ;;  %1434 = vmatmul.mubr.bf16.gmra.mxu1 %v1184_v44 }
 0x15c   : > { %v778_v51 = vadd.f32 %v777_v50, %v2816_v14  ;;  %v1068_v52 = vmax.f32 %v776_v48, 0.0 }
 0x15d   : > { %v781_v53 = vpop.f32.mrf.mxu0  ;;  %1020 = vmatmul.mubr.bf16.gmra.mxu0 %v2402_v46 }
 0x15e   : > { %v1069_v55 = vmax.f32 %v778_v51, 0.0  ;;  %1029 = vmatprep.mubr.bf16.mxu0 %v2534_v1  ;;  %v1186_v62 = vpack.c.bf16 %v1068_v52, %v1066_v56  ;;  %v782_v9 = vadd.f32 %v781_v53, %v2814_v13  ;;  %v742_v52 = vadd.f32 %v2800_v2, %v2814_v13 }
 0x15f   : > { %v783_v57 = vpop.f32.mrf.mxu0 }
 0x160   : > { %v1187_v58 = vpack.c.bf16 %v1069_v55, %v1067_v54  ;;  %v784_v6 = vadd.f32 %v783_v57, %v2816_v14  ;;  %v1070_v20 = vmax.f32 %v782_v9, 0.0  ;;  %v1056_v57 = vmax.f32 %v746_v3, 0.0 }
 0x161   : > { %v785_v0 = vpop.f32.mrf.mxu0 }
 0x162   : > { %v786_v8 = vadd.f32 %v785_v0, %v2814_v13  ;;  %1441 = vmatprep.mubr.bf16.mxu1 %v1187_v58  ;;  %v1071_v18 = vmax.f32 %v784_v6, 0.0  ;;  %v1054_v0 = vmax.f32 %v742_v52, 0.0 }
 0x163   : > { %v787_v10 = vpop.f32.mrf.mxu0  ;;  %1442 = vmatmul.mubr.bf16.gmra.mxu1 %v1186_v62 }
 0x164   : > { %v788_v12 = vadd.f32 %v787_v10, %v2816_v14  ;;  %v1072_v15 = vmax.f32 %v786_v8, 0.0  ;;  %v1180_v10 = vpack.c.bf16 %v1056_v57, %v1054_v0 }
 0x165   : > { %v791_v16 = vpop.f32.mrf.mxu0  ;;  %1030 = vmatmul.mubr.bf16.gmra.mxu0 %v2403_v4 }
 0x166   : > { %v1073_v19 = vmax.f32 %v788_v12, 0.0  ;;  %1039 = vmatprep.mubr.bf16.mxu0 %v2534_v1  ;;  %v1188_v24 = vpack.c.bf16 %v1072_v15, %v1070_v20  ;;  %v792_v29 = vadd.f32 %v791_v16, %v2814_v13  ;;  %v748_v1 = vadd.f32 %v2808_v7, %v2816_v14 }
 0x167   : > { %v793_v21 = vpop.f32.mrf.mxu0 }
 0x168   : > { %v1189_v23 = vpack.c.bf16 %v1073_v19, %v1071_v18  ;;  %v794_v27 = vadd.f32 %v793_v21, %v2816_v14  ;;  %v1074_v39 = vmax.f32 %v792_v29, 0.0  ;;  %v1057_v41 = vmax.f32 %v748_v1, 0.0 }
 0x169   : > { %v795_v25 = vpop.f32.mrf.mxu0 }
 0x16a   : > { %v796_v28 = vadd.f32 %v795_v25, %v2814_v13  ;;  %1449 = vmatprep.mubr.bf16.mxu1 %v1189_v23  ;;  %v1075_v61 = vmax.f32 %v794_v27, 0.0  ;;  %v1181_v51 = vpack.c.bf16 %v1057_v41, %v1055_v45 }
 0x16b   : > { %v797_v30 = vpop.f32.mrf.mxu0  ;;  %1450 = vmatmul.mubr.bf16.gmra.mxu1 %v1188_v24 }
 0x16c   : > { %v798_v31 = vadd.f32 %v797_v30, %v2816_v14  ;;  %v1076_v34 = vmax.f32 %v796_v28, 0.0 }
 0x16d   : > { %v801_v35 = vpop.f32.mrf.mxu0  ;;  %1040 = vmatmul.mubr.bf16.gmra.mxu0 %v2404_v26 }
 0x16e   : > { %v1077_v37 = vmax.f32 %v798_v31, 0.0  ;;  %1409 = vmatprep.mubr.bf16.mxu0 %v1179_v32  ;;  %v1190_v43 = vpack.c.bf16 %v1076_v34, %v1074_v39  ;;  %v802_v48 = vadd.f32 %v801_v35, %v2814_v13 }
 0x16f   : > { %v803_v40 = vpop.f32.mrf.mxu0 }
 0x170   : > { %v1191_v7 = vpack.c.bf16 %v1077_v37, %v1075_v61  ;;  %v804_v59 = vadd.f32 %v803_v40, %v2816_v14  ;;  %v1078_v58 = vmax.f32 %v802_v48, 0.0 }
 0x171   : > { %v805_v44 = vpop.f32.mrf.mxu0 }
 0x172   : > { %v806_v46 = vadd.f32 %v805_v44, %v2814_v13  ;;  %1457 = vmatprep.mubr.bf16.mxu1 %v1191_v7  ;;  %v1079_v55 = vmax.f32 %v804_v59, 0.0 }
 0x173   : > { %v807_v49 = vpop.f32.mrf.mxu0  ;;  %1458 = vmatmul.mubr.bf16.gmra.mxu1 %v1190_v43 }
 0x174   : > { %v808_v50 = vadd.f32 %v807_v49, %v2816_v14  ;;  %v1080_v53 = vmax.f32 %v806_v46, 0.0 }
 0x175   : > { %v811_v54 = vpop.f32.mrf.mxu0  ;;  %1410 = vmatmul.mubr.bf16.vlgmr.msra.gmra.mxu0 %v1178_v47 }
 0x176   : > { %v1081_v56 = vmax.f32 %v808_v50, 0.0  ;;  %1417 = vmatprep.mubr.bf16.mxu0 %v1181_v51  ;;  %v1192_v4 = vpack.c.bf16 %v1080_v53, %v1078_v58  ;;  %v812_v2 = vadd.f32 %v811_v54, %v2814_v13 }
 0x177   : > { %v813_v62 = vpop.f32.mrf.mxu0 }
 0x178   : > { %v1193_v5 = vpack.c.bf16 %v1081_v56, %v1079_v55  ;;  %v814_v8 = vadd.f32 %v813_v62, %v2816_v14  ;;  %v1082_v19 = vmax.f32 %v812_v2, 0.0 }
 0x179   : > { %v815_v6 = vpop.f32.mrf.mxu0 }
 0x17a   : > { %v816_v9 = vadd.f32 %v815_v6, %v2814_v13  ;;  %1465 = vmatprep.mubr.bf16.mxu1 %v1193_v5  ;;  %v1083_v17 = vmax.f32 %v814_v8, 0.0 }
 0x17b   : > { %v817_v11 = vpop.f32.mrf.mxu0  ;;  %1466 = vmatmul.mubr.bf16.gmra.mxu1 %v1192_v4 }
 0x17c   : > { %v818_v12 = vadd.f32 %v817_v11, %v2816_v14  ;;  %v1084_v15 = vmax.f32 %v816_v9, 0.0 }
 0x17d   : > { %v821_v16 = vpop.f32.mrf.mxu0  ;;  %1418 = vmatmul.mubr.bf16.gmra.mxu0 %v1180_v10 }
 0x17e   : > { %v1085_v18 = vmax.f32 %v818_v12, 0.0  ;;  %v1194_v22 = vpack.c.bf16 %v1084_v15, %v1082_v19  ;;  %v822_v26 = vadd.f32 %v821_v16, %v2814_v13 }
 0x17f   : > { %v823_v20 = vpop.f32.mrf.mxu0 }
 0x180   : > { %v1195_v21 = vpack.c.bf16 %v1085_v18, %v1083_v17  ;;  %v824_v24 = vadd.f32 %v823_v20, %v2816_v14  ;;  %v1086_v1 = vmax.f32 %v822_v26, 0.0 }
 0x181   : > { %v825_v23 = vpop.f32.mrf.mxu0 }
 0x182   : > { %v826_v25 = vadd.f32 %v825_v23, %v2814_v13  ;;  %1473 = vmatprep.mubr.bf16.mxu1 %v1195_v21  ;;  %v1087_v29 = vmax.f32 %v824_v24, 0.0 }
 0x183   : > { %v827_v63 = vpop.f32.mrf.mxu0  ;;  %1474 = vmatmul.mubr.bf16.gmra.mxu1 %v1194_v22 }
 0x184   : > { %v828_v27 = vadd.f32 %v827_v63, %v2816_v14  ;;  %v1088_v28 = vmax.f32 %v826_v25, 0.0 }
 0x185   : > { %v831_v60 = vpop.f32.mrf.mxu0 }
 0x186   : > { %v1089_v30 = vmax.f32 %v828_v27, 0.0  ;;  %v1196_v33 = vpack.c.bf16 %v1088_v28, %v1086_v1  ;;  %v832_v61 = vadd.f32 %v831_v60, %v2814_v13 }
 0x187   : > { %v833_v31 = vpop.f32.mrf.mxu0 }
 0x188   : > { %v1197_v32 = vpack.c.bf16 %v1089_v30, %v1087_v29  ;;  %v834_v35 = vadd.f32 %v833_v31, %v2816_v14  ;;  %v1090_v42 = vmax.f32 %v832_v61, 0.0 }
 0x189   : > { %v835_v34 = vpop.f32.mrf.mxu0 }
 0x18a   : > { %v836_v36 = vadd.f32 %v835_v34, %v2814_v13  ;;  %1481 = vmatprep.mubr.bf16.mxu1 %v1197_v32  ;;  %v1091_v41 = vmax.f32 %v834_v35, 0.0 }
 0x18b   : > { %v837_v37 = vpop.f32.mrf.mxu0  ;;  %1482 = vmatmul.mubr.bf16.gmra.mxu1 %v1196_v33 }
 0x18c   : > { %v838_v38 = vadd.f32 %v837_v37, %v2816_v14  ;;  %v1092_v39 = vmax.f32 %v836_v36, 0.0 }
 0x18d   : > { %v841_v40 = vpop.f32.mrf.mxu0 }
 0x18e   : > { %v1093_v7 = vmax.f32 %v838_v38, 0.0  ;;  %v1198_v45 = vpack.c.bf16 %v1092_v39, %v1090_v42  ;;  %v842_v3 = vadd.f32 %v841_v40, %v2814_v13 }
 0x18f   : > { %v843_v43 = vpop.f32.mrf.mxu0 }
 0x190   : > { %v1199_v44 = vpack.c.bf16 %v1093_v7, %v1091_v41  ;;  %v844_v46 = vadd.f32 %v843_v43, %v2816_v14  ;;  %v1094_v54 = vmax.f32 %v842_v3, 0.0 }
 0x191   : > { %v845_v59 = vpop.f32.mrf.mxu0 }
 0x192   : > { %v846_v47 = vadd.f32 %v845_v59, %v2814_v13  ;;  %1489 = vmatprep.mubr.bf16.mxu1 %v1199_v44  ;;  %v1095_v52 = vmax.f32 %v844_v46, 0.0 }
 0x193   : > { %v847_v48 = vpop.f32.mrf.mxu0  ;;  %1490 = vmatmul.mubr.bf16.gmra.mxu1 %v1198_v45 }
 0x194   : > { %v848_v49 = vadd.f32 %v847_v48, %v2816_v14  ;;  %v1096_v50 = vmax.f32 %v846_v47, 0.0 }
 0x195   : > { %v851_v51 = vpop.f32.mrf.mxu0 }
 0x196   : > { %v1097_v53 = vmax.f32 %v848_v49, 0.0  ;;  %v1200_v57 = vpack.c.bf16 %v1096_v50, %v1094_v54  ;;  %v852_v0 = vadd.f32 %v851_v51, %v2814_v13 }
 0x197   : > { %v853_v55 = vpop.f32.mrf.mxu0 }
 0x198   : > { %v1201_v56 = vpack.c.bf16 %v1097_v53, %v1095_v52  ;;  %v854_v62 = vadd.f32 %v853_v55, %v2816_v14  ;;  %v1098_v11 = vmax.f32 %v852_v0, 0.0 }
 0x199   : > { %v855_v58 = vpop.f32.mrf.mxu0 }
 0x19a   : > { %v856_v5 = vadd.f32 %v855_v58, %v2814_v13  ;;  %1497 = vmatprep.mubr.bf16.mxu1 %v1201_v56  ;;  %v1099_v10 = vmax.f32 %v854_v62, 0.0 }
 0x19b   : > { %v857_v4 = vpop.f32.mrf.mxu0  ;;  %1498 = vmatmul.mubr.bf16.gmra.mxu1 %v1200_v57 }
 0x19c   : > { %v858_v6 = vadd.f32 %v857_v4, %v2816_v14  ;;  %v1100_v8 = vmax.f32 %v856_v5, 0.0 }
 0x19d   : > { %v861_v9 = vpop.f32.mrf.mxu0 }
 0x19e   : > { %v1101_v2 = vmax.f32 %v858_v6, 0.0  ;;  %v1202_v16 = vpack.c.bf16 %v1100_v8, %v1098_v11  ;;  %v862_v20 = vadd.f32 %v861_v9, %v2814_v13 }
 0x19f   : > { %v863_v12 = vpop.f32.mrf.mxu0 }
 0x1a0   : > { %v1203_v15 = vpack.c.bf16 %v1101_v2, %v1099_v10  ;;  %v864_v18 = vadd.f32 %v863_v12, %v2816_v14  ;;  %v1102_v63 = vmax.f32 %v862_v20, 0.0 }
 0x1a1   : > { %v865_v17 = vpop.f32.mrf.mxu0 }
 0x1a2   : > { %v866_v19 = vadd.f32 %v865_v17, %v2814_v13  ;;  %1505 = vmatprep.mubr.bf16.mxu1 %v1203_v15  ;;  %v1103_v25 = vmax.f32 %v864_v18, 0.0 }
 0x1a3   : > { %v867_v21 = vpop.f32.mrf.mxu0  ;;  %1506 = vmatmul.mubr.bf16.gmra.mxu1 %v1202_v16 }
 0x1a4   : > { %v868_v22 = vadd.f32 %v867_v21, %v2816_v14  ;;  %v1104_v23 = vmax.f32 %v866_v19, 0.0 }
 0x1a5   : > { %v871_v24 = vpop.f32.mrf.mxu0 }
 0x1a6   : > { %v1105_v26 = vmax.f32 %v868_v22, 0.0  ;;  %v1204_v60 = vpack.c.bf16 %v1104_v23, %v1102_v63  ;;  %v872_v31 = vadd.f32 %v871_v24, %v2814_v13 }
 0x1a7   : > { %v873_v27 = vpop.f32.mrf.mxu0 }
 0x1a8   : > { %v1205_v28 = vpack.c.bf16 %v1105_v26, %v1103_v25  ;;  %v874_v30 = vadd.f32 %v873_v27, %v2816_v14  ;;  %v1106_v37 = vmax.f32 %v872_v31, 0.0 }
 0x1a9   : > { %v875_v29 = vpop.f32.mrf.mxu0 }
 0x1aa   : > { %v876_v1 = vadd.f32 %v875_v29, %v2814_v13  ;;  %1513 = vmatprep.mubr.bf16.mxu1 %v1205_v28  ;;  %v1107_v36 = vmax.f32 %v874_v30, 0.0 }
 0x1ab   : > { %v877_v32 = vpop.f32.mrf.mxu0  ;;  %1514 = vmatmul.mubr.bf16.gmra.mxu1 %v1204_v60 }
 0x1ac   : > { %v878_v33 = vadd.f32 %v877_v32, %v2816_v14  ;;  %v1108_v34 = vmax.f32 %v876_v1, 0.0 }
 0x1ad   : > { %v881_v35 = vpop.f32.mrf.mxu0 }
 0x1ae   : > { %v1109_v61 = vmax.f32 %v878_v33, 0.0  ;;  %v1206_v40 = vpack.c.bf16 %v1108_v34, %v1106_v37  ;;  %v882_v43 = vadd.f32 %v881_v35, %v2814_v13 }
 0x1af   : > { %v883_v38 = vpop.f32.mrf.mxu0 }
 0x1b0   : > { %v1207_v39 = vpack.c.bf16 %v1109_v61, %v1107_v36  ;;  %v884_v7 = vadd.f32 %v883_v38, %v2816_v14  ;;  %v1110_v48 = vmax.f32 %v882_v43, 0.0 }
 0x1b1   : > { %v885_v41 = vpop.f32.mrf.mxu0 }
 0x1b2   : > { %v886_v42 = vadd.f32 %v885_v41, %v2814_v13  ;;  %1521 = vmatprep.mubr.bf16.mxu1 %v1207_v39  ;;  %v1111_v47 = vmax.f32 %v884_v7, 0.0 }
 0x1b3   : > { %v887_v44 = vpop.f32.mrf.mxu0  ;;  %1522 = vmatmul.mubr.bf16.gmra.mxu1 %v1206_v40 }
 0x1b4   : > { %v888_v45 = vadd.f32 %v887_v44, %v2816_v14  ;;  %v1112_v59 = vmax.f32 %v886_v42, 0.0 }
 0x1b5   : > { %v891_v46 = vpop.f32.mrf.mxu0 }
 0x1b6   : > { %v1113_v3 = vmax.f32 %v888_v45, 0.0  ;;  %v1208_v51 = vpack.c.bf16 %v1112_v59, %v1110_v48  ;;  %v892_v55 = vadd.f32 %v891_v46, %v2814_v13 }
 0x1b7   : > { %v893_v49 = vpop.f32.mrf.mxu0 }
 0x1b8   : > { %v1209_v50 = vpack.c.bf16 %v1113_v3, %v1111_v47  ;;  %v894_v53 = vadd.f32 %v893_v49, %v2816_v14  ;;  %v1114_v4 = vmax.f32 %v892_v55, 0.0 }
 0x1b9   : > { %v895_v52 = vpop.f32.mrf.mxu0 }
 0x1ba   : > { %v896_v54 = vadd.f32 %v895_v52, %v2814_v13  ;;  %1529 = vmatprep.mubr.bf16.mxu1 %v1209_v50  ;;  %v1115_v5 = vmax.f32 %v894_v53, 0.0 }
 0x1bb   : > { %v897_v56 = vpop.f32.mrf.mxu0  ;;  %1530 = vmatmul.mubr.bf16.gmra.mxu1 %v1208_v51 }
 0x1bc   : > { %v898_v57 = vadd.f32 %v897_v56, %v2816_v14  ;;  %v1116_v58 = vmax.f32 %v896_v54, 0.0 }
 0x1bd   : > { %v901_v62 = vpop.f32.mrf.mxu0 }
 0x1be   : > { %v1117_v0 = vmax.f32 %v898_v57, 0.0  ;;  %v1210_v9 = vpack.c.bf16 %v1116_v58, %v1114_v4  ;;  %v902_v12 = vadd.f32 %v901_v62, %v2814_v13 }
 0x1bf   : > { %v903_v6 = vpop.f32.mrf.mxu0 }
 0x1c0   : > { %v1211_v8 = vpack.c.bf16 %v1117_v0, %v1115_v5  ;;  %v904_v2 = vadd.f32 %v903_v6, %v2816_v14  ;;  %v1118_v21 = vmax.f32 %v902_v12, 0.0 }
 0x1c1   : > { %v905_v10 = vpop.f32.mrf.mxu0 }
 0x1c2   : > { %v906_v11 = vadd.f32 %v905_v10, %v2814_v13  ;;  %1537 = vmatprep.mubr.bf16.mxu1 %v1211_v8  ;;  %v1119_v19 = vmax.f32 %v904_v2, 0.0 }
 0x1c3   : > { %v907_v15 = vpop.f32.mrf.mxu0  ;;  %1538 = vmatmul.mubr.bf16.gmra.mxu1 %v1210_v9 }
 0x1c4   : > { %v908_v16 = vadd.f32 %v907_v15, %v2816_v14  ;;  %v1120_v17 = vmax.f32 %v906_v11, 0.0 }
 0x1c5   : > { %v911_v18 = vpop.f32.mrf.mxu0 }
 0x1c6   : > { %v1121_v20 = vmax.f32 %v908_v16, 0.0  ;;  %v1212_v24 = vpack.c.bf16 %v1120_v17, %v1118_v21  ;;  %v912_v27 = vadd.f32 %v911_v18, %v2814_v13 }
 0x1c7   : > { %v913_v22 = vpop.f32.mrf.mxu0 }
 0x1c8   : > { %v1213_v23 = vpack.c.bf16 %v1121_v20, %v1119_v19  ;;  %v914_v26 = vadd.f32 %v913_v22, %v2816_v14  ;;  %v1122_v32 = vmax.f32 %v912_v27, 0.0 }
 0x1c9   : > { %v915_v25 = vpop.f32.mrf.mxu0 }
 0x1ca   : > { %v916_v63 = vadd.f32 %v915_v25, %v2814_v13  ;;  %1545 = vmatprep.mubr.bf16.mxu1 %v1213_v23  ;;  %v1123_v1 = vmax.f32 %v914_v26, 0.0 }
 0x1cb   : > { %v917_v28 = vpop.f32.mrf.mxu0  ;;  %1546 = vmatmul.mubr.bf16.gmra.mxu1 %v1212_v24 }
 0x1cc   : > { %v918_v60 = vadd.f32 %v917_v28, %v2816_v14  ;;  %v1124_v29 = vmax.f32 %v916_v63, 0.0 }
 0x1cd   : > { %v921_v30 = vpop.f32.mrf.mxu0 }
 0x1ce   : > { %v1125_v31 = vmax.f32 %v918_v60, 0.0  ;;  %v1214_v35 = vpack.c.bf16 %v1124_v29, %v1122_v32  ;;  %v922_v38 = vadd.f32 %v921_v30, %v2814_v13 }
 0x1cf   : > { %v923_v33 = vpop.f32.mrf.mxu0 }
 0x1d0   : > { %v1215_v34 = vpack.c.bf16 %v1125_v31, %v1123_v1  ;;  %v924_v61 = vadd.f32 %v923_v33, %v2816_v14  ;;  %v1126_v44 = vmax.f32 %v922_v38, 0.0 }
 0x1d1   : > { %v925_v36 = vpop.f32.mrf.mxu0 }
 0x1d2   : > { %v926_v37 = vadd.f32 %v925_v36, %v2814_v13  ;;  %1553 = vmatprep.mubr.bf16.mxu1 %v1215_v34  ;;  %v1127_v42 = vmax.f32 %v924_v61, 0.0 }
 0x1d3   : > { %v927_v39 = vpop.f32.mrf.mxu0  ;;  %1554 = vmatmul.mubr.bf16.gmra.mxu1 %v1214_v35 }
 0x1d4   : > { %v928_v40 = vadd.f32 %v927_v39, %v2816_v14  ;;  %v1128_v41 = vmax.f32 %v926_v37, 0.0 }
 0x1d5   : > { %v931_v7 = vpop.f32.mrf.mxu0 }
 0x1d6   : > { %v1129_v43 = vmax.f32 %v928_v40, 0.0  ;;  %v1216_v46 = vpack.c.bf16 %v1128_v41, %v1126_v44  ;;  %v932_v49 = vadd.f32 %v931_v7, %v2814_v13 }
 0x1d7   : > { %v933_v45 = vpop.f32.mrf.mxu0 }
 0x1d8   : > { %v1217_v59 = vpack.c.bf16 %v1129_v43, %v1127_v42  ;;  %v934_v3 = vadd.f32 %v933_v45, %v2816_v14  ;;  %v1130_v56 = vmax.f32 %v932_v49, 0.0 }
 0x1d9   : > { %v935_v47 = vpop.f32.mrf.mxu0 }
 0x1da   : > { %v936_v48 = vadd.f32 %v935_v47, %v2814_v13  ;;  %1561 = vmatprep.mubr.bf16.mxu1 %v1217_v59  ;;  %v1131_v54 = vmax.f32 %v934_v3, 0.0 }
 0x1db   : > { %v937_v50 = vpop.f32.mrf.mxu0  ;;  %1562 = vmatmul.mubr.bf16.gmra.mxu1 %v1216_v46 }
 0x1dc   : > { %v938_v51 = vadd.f32 %v937_v50, %v2816_v14  ;;  %v1132_v52 = vmax.f32 %v936_v48, 0.0 }
 0x1dd   : > { %v941_v53 = vpop.f32.mrf.mxu0 }
 0x1de   : > { %v1133_v55 = vmax.f32 %v938_v51, 0.0  ;;  %v1218_v62 = vpack.c.bf16 %v1132_v52, %v1130_v56  ;;  %v942_v6 = vadd.f32 %v941_v53, %v2814_v13 }
 0x1df   : > { %v943_v57 = vpop.f32.mrf.mxu0 }
 0x1e0   : > { %v1219_v58 = vpack.c.bf16 %v1133_v55, %v1131_v54  ;;  %v944_v0 = vadd.f32 %v943_v57, %v2816_v14  ;;  %v1134_v15 = vmax.f32 %v942_v6, 0.0 }
 0x1e1   : > { %v945_v5 = vpop.f32.mrf.mxu0 }
 0x1e2   : > { %v946_v4 = vadd.f32 %v945_v5, %v2814_v13  ;;  %1569 = vmatprep.mubr.bf16.mxu1 %v1219_v58  ;;  %v1135_v11 = vmax.f32 %v944_v0, 0.0 }
 0x1e3   : > { %v947_v8 = vpop.f32.mrf.mxu0  ;;  %1570 = vmatmul.mubr.bf16.gmra.mxu1 %v1218_v62 }
 0x1e4   : > { %v948_v9 = vadd.f32 %v947_v8, %v2816_v14  ;;  %v1136_v10 = vmax.f32 %v946_v4, 0.0 }
 0x1e5   : > { %v951_v2 = vpop.f32.mrf.mxu0 }
 0x1e6   : > { %v1137_v12 = vmax.f32 %v948_v9, 0.0  ;;  %v1220_v18 = vpack.c.bf16 %v1136_v10, %v1134_v15  ;;  %v952_v22 = vadd.f32 %v951_v2, %v2814_v13 }
 0x1e7   : > { %v953_v16 = vpop.f32.mrf.mxu0 }
 0x1e8   : > { %v1221_v17 = vpack.c.bf16 %v1137_v12, %v1135_v11  ;;  %v954_v20 = vadd.f32 %v953_v16, %v2816_v14  ;;  %v1138_v28 = vmax.f32 %v952_v22, 0.0 }
 0x1e9   : > { %v955_v19 = vpop.f32.mrf.mxu0 }
 0x1ea   : > { %v956_v21 = vadd.f32 %v955_v19, %v2814_v13  ;;  %1577 = vmatprep.mubr.bf16.mxu1 %v1221_v17  ;;  %v1139_v63 = vmax.f32 %v954_v20, 0.0 }
 0x1eb   : > { %v957_v23 = vpop.f32.mrf.mxu0  ;;  %1578 = vmatmul.mubr.bf16.gmra.mxu1 %v1220_v18 }
 0x1ec   : > { %v958_v24 = vadd.f32 %v957_v23, %v2816_v14  ;;  %v1140_v25 = vmax.f32 %v956_v21, 0.0 }
 0x1ed   : > { %v961_v26 = vpop.f32.mrf.mxu0 }
 0x1ee   : > { %v1141_v27 = vmax.f32 %v958_v24, 0.0  ;;  %v1222_v30 = vpack.c.bf16 %v1140_v25, %v1138_v28  ;;  %v962_v33 = vadd.f32 %v961_v26, %v2814_v13 }
 0x1ef   : > { %v963_v60 = vpop.f32.mrf.mxu0 }
 0x1f0   : > { %v1223_v29 = vpack.c.bf16 %v1141_v27, %v1139_v63  ;;  %v964_v31 = vadd.f32 %v963_v60, %v2816_v14  ;;  %v1142_v39 = vmax.f32 %v962_v33, 0.0  ;;  %v2946_v27 = vld [vmem:[%s3317_s4] ss:$0 sm:$0xff] }
 0x1f1   : > { %v965_v1 = vpop.f32.mrf.mxu0 }
 0x1f2   : > { %v966_v32 = vadd.f32 %v965_v1, %v2814_v13  ;;  %1585 = vmatprep.mubr.bf16.mxu1 %v1223_v29  ;;  %v1143_v37 = vmax.f32 %v964_v31, 0.0 }
 0x1f3   : > { %v967_v34 = vpop.f32.mrf.mxu0  ;;  %1586 = vmatmul.mubr.bf16.gmra.mxu1 %v1222_v30 }
 0x1f4   : > { %v968_v35 = vadd.f32 %v967_v34, %v2816_v14  ;;  %v1144_v36 = vmax.f32 %v966_v32, 0.0 }
 0x1f5   : > { %v971_v61 = vpop.f32.mrf.mxu0 }
 0x1f6   : > { %v1145_v38 = vmax.f32 %v968_v35, 0.0  ;;  %v1224_v7 = vpack.c.bf16 %v1144_v36, %v1142_v39  ;;  %v972_v45 = vadd.f32 %v971_v61, %v2814_v13 }
 0x1f7   : > { %v973_v40 = vpop.f32.mrf.mxu0 }
 0x1f8   : > { %v1225_v41 = vpack.c.bf16 %v1145_v38, %v1143_v37  ;;  %v974_v43 = vadd.f32 %v973_v40, %v2816_v14  ;;  %v1146_v50 = vmax.f32 %v972_v45, 0.0  ;;  %v2956_v38 = vld [vmem:[%s3318_s5] ss:$0 sm:$0xff] }
 0x1f9   : > { %v975_v42 = vpop.f32.mrf.mxu0 }
 0x1fa   : > { %v976_v44 = vadd.f32 %v975_v42, %v2814_v13  ;;  %1593 = vmatprep.mubr.bf16.mxu1 %v1225_v41  ;;  %v1147_v48 = vmax.f32 %v974_v43, 0.0 }
 0x1fb   : > { %v977_v59 = vpop.f32.mrf.mxu0  ;;  %1594 = vmatmul.mubr.bf16.gmra.mxu1 %v1224_v7 }
 0x1fc   : > { %v978_v46 = vadd.f32 %v977_v59, %v2816_v14  ;;  %v1148_v47 = vmax.f32 %v976_v44, 0.0 }
 0x1fd   : > { %v981_v3 = vpop.f32.mrf.mxu0 }
 0x1fe   : > { %v1149_v49 = vmax.f32 %v978_v46, 0.0  ;;  %v1226_v53 = vpack.c.bf16 %v1148_v47, %v1146_v50  ;;  %v982_v57 = vadd.f32 %v981_v3, %v2814_v13 }
 0x1ff   : > { %v983_v51 = vpop.f32.mrf.mxu0 }
 0x200   : > { %v1227_v52 = vpack.c.bf16 %v1149_v49, %v1147_v48  ;;  %v984_v55 = vadd.f32 %v983_v51, %v2816_v14  ;;  %v1150_v8 = vmax.f32 %v982_v57, 0.0 }
 0x201   : > { %v985_v54 = vpop.f32.mrf.mxu0 }
 0x202   : > { %v986_v56 = vadd.f32 %v985_v54, %v2814_v13  ;;  %1601 = vmatprep.mubr.bf16.mxu1 %v1227_v52  ;;  %v1151_v4 = vmax.f32 %v984_v55, 0.0 }
 0x203   : > { %v987_v58 = vpop.f32.mrf.mxu0  ;;  %1602 = vmatmul.mubr.bf16.gmra.mxu1 %v1226_v53 }
 0x204   : > { %v988_v62 = vadd.f32 %v987_v58, %v2816_v14  ;;  %v1152_v5 = vmax.f32 %v986_v56, 0.0 }
 0x205   : > { %v991_v0 = vpop.f32.mrf.mxu0 }
 0x206   : > { %v1153_v6 = vmax.f32 %v988_v62, 0.0  ;;  %v1228_v2 = vpack.c.bf16 %v1152_v5, %v1150_v8  ;;  %v992_v16 = vadd.f32 %v991_v0, %v2814_v13 }
 0x207   : > { %v993_v9 = vpop.f32.mrf.mxu0 }
 0x208   : > { %v1229_v10 = vpack.c.bf16 %v1153_v6, %v1151_v4  ;;  %v994_v12 = vadd.f32 %v993_v9, %v2816_v14  ;;  %v1154_v23 = vmax.f32 %v992_v16, 0.0 }
 0x209   : > { %v995_v11 = vpop.f32.mrf.mxu0 }
 0x20a   : > { %v996_v15 = vadd.f32 %v995_v11, %v2814_v13  ;;  %1609 = vmatprep.mubr.bf16.mxu1 %v1229_v10  ;;  %v1155_v21 = vmax.f32 %v994_v12, 0.0 }
 0x20b   : > { %v997_v17 = vpop.f32.mrf.mxu0  ;;  %1610 = vmatmul.mubr.bf16.gmra.mxu1 %v1228_v2 }
 0x20c   : > { %v998_v18 = vadd.f32 %v997_v17, %v2816_v14  ;;  %v1156_v19 = vmax.f32 %v996_v15, 0.0 }
 0x20d   : > { %v1001_v20 = vpop.f32.mrf.mxu0 }
 0x20e   : > { %v1157_v22 = vmax.f32 %v998_v18, 0.0  ;;  %v1230_v26 = vpack.c.bf16 %v1156_v19, %v1154_v23  ;;  %v1002_v29 = vadd.f32 %v1001_v20, %v2814_v13 }
 0x20f   : > { %v1003_v24 = vpop.f32.mrf.mxu0 }
 0x210   : > { %v1231_v25 = vpack.c.bf16 %v1157_v22, %v1155_v21  ;;  %v1004_v28 = vadd.f32 %v1003_v24, %v2816_v14  ;;  %v1158_v39 = vmax.f32 %v1002_v29, 0.0 }
 0x211   : > { %v1005_v63 = vpop.f32.mrf.mxu0 }
 0x212   : > { %v1006_v60 = vadd.f32 %v1005_v63, %v2814_v13  ;;  %1617 = vmatprep.mubr.bf16.mxu1 %v1231_v25  ;;  %v1159_v36 = vmax.f32 %v1004_v28, 0.0 }
 0x213   : > { %v1007_v30 = vpop.f32.mrf.mxu0  ;;  %v1427_v1 = vpop.f32.mrf.mxu1  ;;  %1618 = vmatmul.mubr.bf16.gmra.mxu1 %v1230_v26 }
 0x214   : > { %v1008_v31 = vadd.f32 %v1007_v30, %v2816_v14  ;;  %v1428_v32 = vadd.f32 %v2946_v27, %v1427_v1  ;;  %v1160_v33 = vmax.f32 %v1006_v60, 0.0 }
 0x215   : > { %v1011_v34 = vpop.f32.mrf.mxu0  ;;  %v1429_v35 = vpop.f32.mrf.mxu1 }
 0x216   : > { %v1161_v61 = vmax.f32 %v1008_v31, 0.0  ;;  %v1670_v37 = vmax.f32 %v1428_v32, 0.0  ;;  %v1232_v43 = vpack.c.bf16 %v1160_v33, %v1158_v39  ;;  %v1012_v48 = vadd.f32 %v1011_v34, %v2814_v13 }
 0x217   : > { %v1013_v40 = vpop.f32.mrf.mxu0  ;;  %v1430_v41 = vpop.f32.mrf.mxu1 }
 0x218   : > { %v1233_v7 = vpack.c.bf16 %v1161_v61, %v1159_v36  ;;  %v1431_v42 = vadd.f32 %v2946_v27, %v1430_v41  ;;  %v1741_v59 = vmul.f32 %v2956_v38, %v1670_v37  ;;  %v1014_v46 = vadd.f32 %v1013_v40, %v2816_v14 }
 0x219   : > { %v1015_v44 = vpop.f32.mrf.mxu0  ;;  %v1432_v45 = vpop.f32.mrf.mxu1  ;;  %v1162_v5 = vmax.f32 %v1012_v48, 0.0 }
 0x21a   : > { %v1671_v47 = vmax.f32 %v1431_v42, 0.0  ;;  %v1016_v3 = vadd.f32 %v1015_v44, %v2814_v13  ;;  %1625 = vmatprep.mubr.bf16.mxu1 %v1233_v7  ;;  %1809 = vadd.xlane.f32.xlu0 %v1741_v59  ;;  %v1163_v57 = vmax.f32 %v1014_v46, 0.0 }
 0x21b   : > { %v1017_v49 = vpop.f32.mrf.mxu0  ;;  %v1435_v50 = vpop.f32.mrf.mxu1  ;;  %1626 = vmatmul.mubr.bf16.gmra.mxu1 %v1232_v43 }
 0x21c   : > { %v1018_v51 = vadd.f32 %v1017_v49, %v2816_v14  ;;  %v1436_v52 = vadd.f32 %v2946_v27, %v1435_v50  ;;  %v1742_v53 = vmul.f32 %v2956_v38, %v1671_v47  ;;  %v1164_v54 = vmax.f32 %v1016_v3, 0.0 }
 0x21d   : > { %v1021_v55 = vpop.f32.mrf.mxu0  ;;  %v1437_v56 = vpop.f32.mrf.mxu1 }
 0x21e   : > { %v1165_v58 = vmax.f32 %v1018_v51, 0.0  ;;  %v1672_v62 = vmax.f32 %v1436_v52, 0.0  ;;  %1811 = vadd.xlane.f32.xlu1 %v1742_v53  ;;  %v1234_v9 = vpack.c.bf16 %v1164_v54, %v1162_v5  ;;  %v1022_v17 = vadd.f32 %v1021_v55, %v2814_v13 }
 0x21f   : > { %v1023_v0 = vpop.f32.mrf.mxu0  ;;  %v1438_v4 = vpop.f32.mrf.mxu1 }
 0x220   : > { %v1235_v6 = vpack.c.bf16 %v1165_v58, %v1163_v57  ;;  %v1439_v8 = vadd.f32 %v2946_v27, %v1438_v4  ;;  %v1743_v11 = vmul.f32 %v2956_v38, %v1672_v62  ;;  %v1024_v12 = vadd.f32 %v1023_v0, %v2816_v14 }
 0x221   : > { %v1025_v10 = vpop.f32.mrf.mxu0  ;;  %v1440_v2 = vpop.f32.mrf.mxu1  ;;  %v1166_v60 = vmax.f32 %v1022_v17, 0.0 }
 0x222   : > { %v1673_v15 = vmax.f32 %v1439_v8, 0.0  ;;  %v1026_v16 = vadd.f32 %v1025_v10, %v2814_v13  ;;  %1633 = vmatprep.mubr.bf16.mxu1 %v1235_v6  ;;  %1813 = vadd.xlane.f32.xlu0 %v1743_v11  ;;  %v1167_v26 = vmax.f32 %v1024_v12, 0.0 }
 0x223   : > { %v1027_v18 = vpop.f32.mrf.mxu0  ;;  %v1443_v19 = vpop.f32.mrf.mxu1  ;;  %1634 = vmatmul.mubr.bf16.gmra.mxu1 %v1234_v9 }
 0x224   : > { %v1028_v20 = vadd.f32 %v1027_v18, %v2816_v14  ;;  %v1444_v21 = vadd.f32 %v2946_v27, %v1443_v19  ;;  %v1744_v22 = vmul.f32 %v2956_v38, %v1673_v15  ;;  %v1168_v23 = vmax.f32 %v1026_v16, 0.0 }
 0x225   : > { %v1031_v24 = vpop.f32.mrf.mxu0  ;;  %v1445_v25 = vpop.f32.mrf.mxu1 }
 0x226   : > { %v1169_v63 = vmax.f32 %v1028_v20, 0.0  ;;  %v1674_v28 = vmax.f32 %v1444_v21, 0.0  ;;  %1815 = vadd.xlane.f32.xlu1 %v1744_v22  ;;  %v1236_v32 = vpack.c.bf16 %v1168_v23, %v1166_v60  ;;  %v1032_v39 = vadd.f32 %v1031_v24, %v2814_v13 }
 0x227   : > { %v1033_v29 = vpop.f32.mrf.mxu0  ;;  %v1446_v30 = vpop.f32.mrf.mxu1 }
 0x228   : > { %v1237_v1 = vpack.c.bf16 %v1169_v63, %v1167_v26  ;;  %v1447_v31 = vadd.f32 %v2946_v27, %v1446_v30  ;;  %v1745_v35 = vmul.f32 %v2956_v38, %v1674_v28  ;;  %v1034_v36 = vadd.f32 %v1033_v29, %v2816_v14 }
 0x229   : > { %v1035_v33 = vpop.f32.mrf.mxu0  ;;  %v1448_v34 = vpop.f32.mrf.mxu1  ;;  %v1170_v48 = vmax.f32 %v1032_v39, 0.0 }
 0x22a   : > { %v1675_v61 = vmax.f32 %v1447_v31, 0.0  ;;  %v1036_v37 = vadd.f32 %v1035_v33, %v2814_v13  ;;  %1641 = vmatprep.mubr.bf16.mxu1 %v1237_v1  ;;  %1817 = vadd.xlane.f32.xlu0 %v1745_v35  ;;  %v1171_v46 = vmax.f32 %v1034_v36, 0.0 }
 0x22b   : > { %v1037_v40 = vpop.f32.mrf.mxu0  ;;  %v1451_v41 = vpop.f32.mrf.mxu1  ;;  %1642 = vmatmul.mubr.bf16.gmra.mxu1 %v1236_v32 }
 0x22c   : > { %v1038_v7 = vadd.f32 %v1037_v40, %v2816_v14  ;;  %v1452_v42 = vadd.f32 %v2946_v27, %v1451_v41  ;;  %v1746_v43 = vmul.f32 %v2956_v38, %v1675_v61  ;;  %v1172_v44 = vmax.f32 %v1036_v37, 0.0 }
 0x22d   : > { %v1041_v45 = vpop.f32.mrf.mxu0  ;;  %v1453_v59 = vpop.f32.mrf.mxu1 }
 0x22e   : > { %v1173_v47 = vmax.f32 %v1038_v7, 0.0  ;;  %v1676_v3 = vmax.f32 %v1452_v42, 0.0  ;;  %1819 = vadd.xlane.f32.xlu1 %v1746_v43  ;;  %v1238_v53 = vpack.c.bf16 %v1172_v44, %v1170_v48  ;;  %v1042_v5 = vadd.f32 %v1041_v45, %v2814_v13 }
 0x22f   : > { %v1043_v49 = vpop.f32.mrf.mxu0  ;;  %v1454_v50 = vpop.f32.mrf.mxu1 }
 0x230   : > { %v1239_v51 = vpack.c.bf16 %v1173_v47, %v1171_v46  ;;  %v1455_v52 = vadd.f32 %v2946_v27, %v1454_v50  ;;  %v1747_v56 = vmul.f32 %v2956_v38, %v1676_v3  ;;  %v1044_v57 = vadd.f32 %v1043_v49, %v2816_v14 }
 0x231   : > { %v1045_v54 = vpop.f32.mrf.mxu0  ;;  %v1456_v55 = vpop.f32.mrf.mxu1 }
 0x232   : > { %v1677_v58 = vmax.f32 %v1455_v52, 0.0  ;;  %v1046_v62 = vadd.f32 %v1045_v54, %v2814_v13  ;;  %1649 = vmatprep.mubr.bf16.mxu1 %v1239_v51  ;;  %1821 = vadd.xlane.f32.xlu0 %v1747_v56  ;;  %v1175_v12 = vmax.f32 %v1044_v57, 0.0  ;;  %v1174_v13 = vmax.f32 %v1042_v5, 0.0 }
 0x233   : > { %v1047_v0 = vpop.f32.mrf.mxu0  ;;  %v1459_v4 = vpop.f32.mrf.mxu1  ;;  %1650 = vmatmul.mubr.bf16.gmra.mxu1 %v1238_v53 }
 0x234   : > { %v1048_v6 = vadd.f32 %v1047_v0, %v2816_v14  ;;  %v1460_v8 = vadd.f32 %v2946_v27, %v1459_v4  ;;  %v1748_v9 = vmul.f32 %v2956_v38, %v1677_v58  ;;  %v1176_v10 = vmax.f32 %v1046_v62, 0.0 }
 0x235   : > { %v1411_v2 = vpop.f32.mrf.mxu0  ;;  %v1461_v11 = vpop.f32.mrf.mxu1 }
 0x236   : > { %v1177_v15 = vmax.f32 %v1048_v6, 0.0  ;;  %v1678_v16 = vmax.f32 %v1460_v8, 0.0  ;;  %v1412_v17 = vadd.f32 %v2946_v27, %v1411_v2  ;;  %1823 = vadd.xlane.f32.xlu1 %v1748_v9  ;;  %v1240_v23 = vpack.c.bf16 %v1176_v10, %v1174_v13 }
 0x237   : > { %v1413_v18 = vpop.f32.mrf.mxu0  ;;  %v1462_v19 = vpop.f32.mrf.mxu1 }
 0x238   : > { %v1241_v20 = vpack.c.bf16 %v1177_v15, %v1175_v12  ;;  %v1666_v21 = vmax.f32 %v1412_v17, 0.0  ;;  %v1463_v14 = vadd.f32 %v2946_v27, %v1462_v19  ;;  %v1749_v22 = vmul.f32 %v2956_v38, %v1678_v16 }
 0x239   : > { %v1414_v24 = vpop.f32.mrf.mxu0  ;;  %v1464_v25 = vpop.f32.mrf.mxu1 }
 0x23a   : > { %v1679_v26 = vmax.f32 %v1463_v14, 0.0  ;;  %v1415_v63 = vadd.f32 %v2946_v27, %v1414_v24  ;;  %1657 = vmatprep.mubr.bf16.mxu1 %v1241_v20  ;;  %1825 = vadd.xlane.f32.xlu0 %v1749_v22  ;;  %v1737_v31 = vmul.f32 %v2956_v38, %v1666_v21 }
 0x23b   : > { %v1416_v28 = vpop.f32.mrf.mxu0  ;;  %v1467_v60 = vpop.f32.mrf.mxu1  ;;  %1658 = vmatmul.mubr.bf16.gmra.mxu1 %v1240_v23 }
 0x23c   : > { %v1667_v29 = vmax.f32 %v1415_v63, 0.0  ;;  %v1468_v30 = vadd.f32 %v2946_v27, %v1467_v60  ;;  %v1750_v1 = vmul.f32 %v2956_v38, %v1679_v26 }
 0x23d   : > { %v1419_v32 = vpop.f32.mrf.mxu0  ;;  %v1469_v33 = vpop.f32.mrf.mxu1 }
 0x23e   : > { %v1420_v34 = vadd.f32 %v2946_v27, %v1419_v32  ;;  %1827 = vadd.xlane.f32.xlu1 %v1750_v1  ;;  %1801 = vadd.xlane.f32.xlu0 %v1737_v31  ;;  %v1680_v61 = vmax.f32 %v1468_v30, 0.0  ;;  %v1738_v40 = vmul.f32 %v2956_v38, %v1667_v29 }
 0x23f   : > { %v1421_v35 = vpop.f32.mrf.mxu0  ;;  %v1470_v36 = vpop.f32.mrf.mxu1 }
 0x240   : > { %v1668_v37 = vmax.f32 %v1420_v34, 0.0  ;;  %v1471_v39 = vadd.f32 %v2946_v27, %v1470_v36  ;;  %v1751_v47 = vmul.f32 %v2956_v38, %v1680_v61 }
 0x241   : > { %v1422_v41 = vpop.f32.mrf.mxu0  ;;  %v1472_v7 = vpop.f32.mrf.mxu1 }
 0x242   : > { %v1681_v42 = vmax.f32 %v1471_v39, 0.0  ;;  %v1423_v43 = vadd.f32 %v2946_v27, %v1422_v41  ;;  %1803 = vadd.xlane.f32.xlu0 %v1738_v40  ;;  %v1739_v44 = vmul.f32 %v2956_v38, %v1668_v37 }
 0x243   : > { %v1424_v45 = vpop.f32.mrf.mxu0  ;;  %v1475_v59 = vpop.f32.mrf.mxu1 }
 0x244   : > { %v1476_v46 = vadd.f32 %v2946_v27, %v1475_v59  ;;  %1805 = vadd.xlane.f32.xlu1 %v1739_v44  ;;  %v1669_v48 = vmax.f32 %v1423_v43, 0.0  ;;  %v1752_v50 = vmul.f32 %v2956_v38, %v1681_v42 }
 0x245   : > { %v1477_v3 = vpop.f32.mrf.mxu1 }
 0x246   : > { %v1682_v49 = vmax.f32 %v1476_v46, 0.0  ;;  %1829 = vadd.xlane.f32.xlu0 %v1751_v47  ;;  %v1740_v56 = vmul.f32 %v2956_v38, %v1669_v48 }
 0x247   : > { %v1478_v51 = vpop.f32.mrf.mxu1 }
 0x248   : > { %v1479_v52 = vadd.f32 %v2946_v27, %v1478_v51  ;;  %1831 = vadd.xlane.f32.xlu1 %v1752_v50  ;;  %v1753_v53 = vmul.f32 %v2956_v38, %v1682_v49 }
 0x249   : > { %v1480_v54 = vpop.f32.mrf.mxu1 }
 0x24a   : > { %v1683_v55 = vmax.f32 %v1479_v52, 0.0  ;;  %1833 = vadd.xlane.f32.xlu0 %v1753_v53 }
 0x24b   : > { %v1483_v57 = vpop.f32.mrf.mxu1 }
 0x24c   : > { %v1484_v58 = vadd.f32 %v2946_v27, %v1483_v57  ;;  %1807 = vadd.xlane.f32.xlu1 %v1740_v56  ;;  %v1754_v0 = vmul.f32 %v2956_v38, %v1683_v55 }
 0x24d   : > { %v1485_v62 = vpop.f32.mrf.mxu1 }
 0x24e   : > { %v1684_v5 = vmax.f32 %v1484_v58, 0.0 }
 0x24f   : > { %v1486_v4 = vpop.f32.mrf.mxu1 }
 0x250   : > { %v1487_v6 = vadd.f32 %v2946_v27, %v1486_v4  ;;  %1835 = vadd.xlane.f32.xlu1 %v1754_v0  ;;  %v1755_v8 = vmul.f32 %v2956_v38, %v1684_v5 }
 0x251   : > { %v1488_v9 = vpop.f32.mrf.mxu1 }
 0x252   : > { %v1685_v10 = vmax.f32 %v1487_v6, 0.0  ;;  %1837 = vadd.xlane.f32.xlu0 %v1755_v8 }
 0x253   : > { %v1491_v2 = vpop.f32.mrf.mxu1 }
 0x254   : > { %v1492_v11 = vadd.f32 %v2946_v27, %v1491_v2  ;;  %v1756_v12 = vmul.f32 %v2956_v38, %v1685_v10 }
 0x255   : > { %v1493_v15 = vpop.f32.mrf.mxu1 }
 0x256   : > { %v1686_v16 = vmax.f32 %v1492_v11, 0.0  ;;  %1839 = vadd.xlane.f32.xlu1 %v1756_v12 }
 0x257   : > { %v1494_v17 = vpop.f32.mrf.mxu1 }
 0x258   : > { %v1495_v13 = vadd.f32 %v2946_v27, %v1494_v17  ;;  %v1757_v18 = vmul.f32 %v2956_v38, %v1686_v16 }
 0x259   : > { %v1496_v19 = vpop.f32.mrf.mxu1 }
 0x25a   : > { %v1687_v20 = vmax.f32 %v1495_v13, 0.0  ;;  %1841 = vadd.xlane.f32.xlu0 %v1757_v18 }
 0x25b   : > { %v1499_v21 = vpop.f32.mrf.mxu1 }
 0x25c   : > { %v1500_v14 = vadd.f32 %v2946_v27, %v1499_v21  ;;  %v1758_v22 = vmul.f32 %v2956_v38, %v1687_v20 }
 0x25d   : > { %v1501_v23 = vpop.f32.mrf.mxu1 }
 0x25e   : > { %v1688_v24 = vmax.f32 %v1500_v14, 0.0  ;;  %1843 = vadd.xlane.f32.xlu1 %v1758_v22 }
 0x25f   : > { %v1502_v25 = vpop.f32.mrf.mxu1 }
 0x260   : > { %v1503_v26 = vadd.f32 %v2946_v27, %v1502_v25  ;;  %v1759_v63 = vmul.f32 %v2956_v38, %v1688_v24 }
 0x261   : > { %v1504_v28 = vpop.f32.mrf.mxu1 }
 0x262   : > { %v1689_v60 = vmax.f32 %v1503_v26, 0.0  ;;  %1845 = vadd.xlane.f32.xlu0 %v1759_v63 }
 0x263   : > { %v1507_v29 = vpop.f32.mrf.mxu1 }
 0x264   : > { %v1508_v30 = vadd.f32 %v2946_v27, %v1507_v29  ;;  %v1760_v1 = vmul.f32 %v2956_v38, %v1689_v60 }
 0x265   : > { %v1509_v31 = vpop.f32.mrf.mxu1 }
 0x266   : > { %v1690_v32 = vmax.f32 %v1508_v30, 0.0  ;;  %1847 = vadd.xlane.f32.xlu1 %v1760_v1 }
 0x267   : > { %v1510_v33 = vpop.f32.mrf.mxu1 }
 0x268   : > { %v1511_v34 = vadd.f32 %v2946_v27, %v1510_v33  ;;  %v1761_v35 = vmul.f32 %v2956_v38, %v1690_v32 }
 0x269   : > { %v1512_v36 = vpop.f32.mrf.mxu1 }
 0x26a   : > { %v1691_v61 = vmax.f32 %v1511_v34, 0.0  ;;  %1849 = vadd.xlane.f32.xlu0 %v1761_v35 }
 0x26b   : > { %v1515_v37 = vpop.f32.mrf.mxu1 }
 0x26c   : > { %v1516_v39 = vadd.f32 %v2946_v27, %v1515_v37  ;;  %v1762_v40 = vmul.f32 %v2956_v38, %v1691_v61 }
 0x26d   : > { %v1517_v41 = vpop.f32.mrf.mxu1 }
 0x26e   : > { %v1692_v7 = vmax.f32 %v1516_v39, 0.0  ;;  %1851 = vadd.xlane.f32.xlu1 %v1762_v40 }
 0x26f   : > { %v1518_v42 = vpop.f32.mrf.mxu1 }
 0x270   : > { %v1519_v43 = vadd.f32 %v2946_v27, %v1518_v42  ;;  %v1763_v44 = vmul.f32 %v2956_v38, %v1692_v7 }
 0x271   : > { %v1520_v45 = vpop.f32.mrf.mxu1 }
 0x272   : > { %v1693_v59 = vmax.f32 %v1519_v43, 0.0  ;;  %1853 = vadd.xlane.f32.xlu0 %v1763_v44  ;;  %v3054_v45 = vld [vmem:[#allocation2] ss:$0 sm:$0xff] }
 0x273   : > { %v1523_v46 = vpop.f32.mrf.mxu1 }
 0x274   : > { %v1524_v47 = vadd.f32 %v2946_v27, %v1523_v46  ;;  %v1764_v3 = vmul.f32 %v2956_v38, %v1693_v59 }
 0x275   : > { %v1525_v48 = vpop.f32.mrf.mxu1 }
 0x276   : > { %v1694_v49 = vmax.f32 %v1524_v47, 0.0  ;;  %1855 = vadd.xlane.f32.xlu1 %v1764_v3 }
 0x277   : > { %v1526_v50 = vpop.f32.mrf.mxu1 }
 0x278   : > { %v1527_v51 = vadd.f32 %v2946_v27, %v1526_v50  ;;  %v1765_v52 = vmul.f32 %v2956_v38, %v1694_v49 }
 0x279   : > { %v1528_v53 = vpop.f32.mrf.mxu1 }
 0x27a   : > { %v1695_v54 = vmax.f32 %v1527_v51, 0.0  ;;  %1857 = vadd.xlane.f32.xlu0 %v1765_v52 }
 0x27b   : > { %v1531_v55 = vpop.f32.mrf.mxu1 }
 0x27c   : > { %v1532_v56 = vadd.f32 %v2946_v27, %v1531_v55  ;;  %v1766_v57 = vmul.f32 %v2956_v38, %v1695_v54 }
 0x27d   : > { %v1533_v58 = vpop.f32.mrf.mxu1 }
 0x27e   : > { %v1696_v62 = vmax.f32 %v1532_v56, 0.0  ;;  %1859 = vadd.xlane.f32.xlu1 %v1766_v57 }
 0x27f   : > { %v1534_v5 = vpop.f32.mrf.mxu1 }
 0x280   : > { %v1535_v0 = vadd.f32 %v2946_v27, %v1534_v5  ;;  %v1767_v4 = vmul.f32 %v2956_v38, %v1696_v62 }
 0x281   : > { %v1536_v6 = vpop.f32.mrf.mxu1 }
 0x282   : > { %v1697_v8 = vmax.f32 %v1535_v0, 0.0  ;;  %1861 = vadd.xlane.f32.xlu0 %v1767_v4 }
 0x283   : > { %v1539_v9 = vpop.f32.mrf.mxu1 }
 0x284   : > { %v1540_v10 = vadd.f32 %v2946_v27, %v1539_v9  ;;  %v1768_v2 = vmul.f32 %v2956_v38, %v1697_v8 }
 0x285   : > { %v1541_v11 = vpop.f32.mrf.mxu1 }
 0x286   : > { %v1698_v12 = vmax.f32 %v1540_v10, 0.0  ;;  %1863 = vadd.xlane.f32.xlu1 %v1768_v2 }
 0x287   : > { %v1542_v15 = vpop.f32.mrf.mxu1 }
 0x288   : > { %v1543_v16 = vadd.f32 %v2946_v27, %v1542_v15  ;;  %v1769_v17 = vmul.f32 %v2956_v38, %v1698_v12 }
 0x289   : > { %v1544_v13 = vpop.f32.mrf.mxu1 }
 0x28a   : > { %v1699_v18 = vmax.f32 %v1543_v16, 0.0  ;;  %1865 = vadd.xlane.f32.xlu0 %v1769_v17 }
 0x28b   : > { %v1547_v19 = vpop.f32.mrf.mxu1 }
 0x28c   : > { %v1548_v20 = vadd.f32 %v2946_v27, %v1547_v19  ;;  %v1770_v21 = vmul.f32 %v2956_v38, %v1699_v18 }
 0x28d   : > { %v1549_v14 = vpop.f32.mrf.mxu1 }
 0x28e   : > { %v1700_v22 = vmax.f32 %v1548_v20, 0.0  ;;  %1867 = vadd.xlane.f32.xlu1 %v1770_v21 }
 0x28f   : > { %v1550_v23 = vpop.f32.mrf.mxu1 }
 0x290   : > { %v1551_v24 = vadd.f32 %v2946_v27, %v1550_v23  ;;  %v1771_v25 = vmul.f32 %v2956_v38, %v1700_v22 }
 0x291   : > { %v1552_v26 = vpop.f32.mrf.mxu1 }
 0x292   : > { %v1701_v63 = vmax.f32 %v1551_v24, 0.0  ;;  %1869 = vadd.xlane.f32.xlu0 %v1771_v25 }
 0x293   : > { %v1555_v28 = vpop.f32.mrf.mxu1 }
 0x294   : > { %v1556_v60 = vadd.f32 %v2946_v27, %v1555_v28  ;;  %v1772_v29 = vmul.f32 %v2956_v38, %v1701_v63 }
 0x295   : > { %v1557_v30 = vpop.f32.mrf.mxu1 }
 0x296   : > { %v1702_v1 = vmax.f32 %v1556_v60, 0.0  ;;  %1871 = vadd.xlane.f32.xlu1 %v1772_v29 }
 0x297   : > { %v1558_v31 = vpop.f32.mrf.mxu1 }
 0x298   : > { %v1559_v32 = vadd.f32 %v2946_v27, %v1558_v31  ;;  %v1773_v33 = vmul.f32 %v2956_v38, %v1702_v1 }
 0x299   : > { %v1560_v34 = vpop.f32.mrf.mxu1 }
 0x29a   : > { %v1703_v35 = vmax.f32 %v1559_v32, 0.0  ;;  %1873 = vadd.xlane.f32.xlu0 %v1773_v33 }
 0x29b   : > { %v1563_v36 = vpop.f32.mrf.mxu1 }
 0x29c   : > { %v1564_v61 = vadd.f32 %v2946_v27, %v1563_v36  ;;  %v1774_v37 = vmul.f32 %v2956_v38, %v1703_v35 }
 0x29d   : > { %v1565_v39 = vpop.f32.mrf.mxu1 }
 0x29e   : > { %v1704_v40 = vmax.f32 %v1564_v61, 0.0  ;;  %1875 = vadd.xlane.f32.xlu1 %v1774_v37 }
 0x29f   : > { %v1566_v41 = vpop.f32.mrf.mxu1 }
 0x2a0   : > { %v1567_v7 = vadd.f32 %v2946_v27, %v1566_v41  ;;  %v1775_v42 = vmul.f32 %v2956_v38, %v1704_v40 }
 0x2a1   : > { %v1568_v43 = vpop.f32.mrf.mxu1 }
 0x2a2   : > { %v1705_v44 = vmax.f32 %v1567_v7, 0.0  ;;  %1877 = vadd.xlane.f32.xlu0 %v1775_v42 }
 0x2a3   : > { %v1571_v59 = vpop.f32.mrf.mxu1  ;;  %v1810_v47 = vpop.xlane.xlu0 %1809 }
 0x2a4   : > { %v1572_v46 = vadd.f32 %v2946_v27, %v1571_v59  ;;  %v1776_v3 = vmul.f32 %v2956_v38, %v1705_v44  ;;  %v1940_v48 = vadd.f32 %v3054_v45, %v1810_v47 }
 0x2a5   : > { %v1573_v49 = vpop.f32.mrf.mxu1 }
 0x2a6   : > { %v1706_v50 = vmax.f32 %v1572_v46, 0.0  ;;  %1879 = vadd.xlane.f32.xlu1 %v1776_v3  ;;  %2005 = vst.msk [vmem:[%s3060_s23 + $0x20] sm:$0xff] %vm2000_vm0, %v1940_v48 }
 0x2a7   : > { %v1574_v51 = vpop.f32.mrf.mxu1  ;;  %v1812_v52 = vpop.xlane.xlu1 %1811 }
 0x2a8   : > { %v1575_v53 = vadd.f32 %v2946_v27, %v1574_v51  ;;  %v1941_v54 = vadd.f32 %v3054_v45, %v1812_v52  ;;  %v1777_v55 = vmul.f32 %v2956_v38, %v1706_v50 }
 0x2a9   : > { %v1576_v56 = vpop.f32.mrf.mxu1 }
 0x2aa   : > { %v1707_v57 = vmax.f32 %v1575_v53, 0.0  ;;  %2006 = vst.msk [vmem:[%s3060_s23 + $0x28] sm:$0xff] %vm2000_vm0, %v1941_v54  ;;  %1881 = vadd.xlane.f32.xlu0 %v1777_v55 }
 0x2ab   : > { %v1579_v58 = vpop.f32.mrf.mxu1  ;;  %v1814_v5 = vpop.xlane.xlu0 %1813 }
 0x2ac   : > { %v1580_v62 = vadd.f32 %v2946_v27, %v1579_v58  ;;  %v1778_v0 = vmul.f32 %v2956_v38, %v1707_v57  ;;  %v1942_v4 = vadd.f32 %v3054_v45, %v1814_v5 }
 0x2ad   : > { %v1581_v6 = vpop.f32.mrf.mxu1 }
 0x2ae   : > { %v1708_v8 = vmax.f32 %v1580_v62, 0.0  ;;  %1883 = vadd.xlane.f32.xlu1 %v1778_v0  ;;  %2007 = vst.msk [vmem:[%s3060_s23 + $0x30] sm:$0xff] %vm2000_vm0, %v1942_v4 }
 0x2af   : > { %v1582_v9 = vpop.f32.mrf.mxu1  ;;  %v1816_v10 = vpop.xlane.xlu1 %1815 }
 0x2b0   : > { %v1583_v2 = vadd.f32 %v2946_v27, %v1582_v9  ;;  %v1943_v11 = vadd.f32 %v3054_v45, %v1816_v10  ;;  %v1779_v12 = vmul.f32 %v2956_v38, %v1708_v8 }
 0x2b1   : > { %v1584_v15 = vpop.f32.mrf.mxu1 }
 0x2b2   : > { %v1709_v16 = vmax.f32 %v1583_v2, 0.0  ;;  %2008 = vst.msk [vmem:[%s3060_s23 + $0x38] sm:$0xff] %vm2000_vm0, %v1943_v11  ;;  %1885 = vadd.xlane.f32.xlu0 %v1779_v12 }
 0x2b3   : > { %v1587_v17 = vpop.f32.mrf.mxu1  ;;  %v1818_v18 = vpop.xlane.xlu0 %1817 }
 0x2b4   : > { %v1588_v13 = vadd.f32 %v2946_v27, %v1587_v17  ;;  %v1780_v19 = vmul.f32 %v2956_v38, %v1709_v16  ;;  %v1944_v20 = vadd.f32 %v3054_v45, %v1818_v18 }
 0x2b5   : > { %v1589_v21 = vpop.f32.mrf.mxu1 }
 0x2b6   : > { %v1710_v14 = vmax.f32 %v1588_v13, 0.0  ;;  %1887 = vadd.xlane.f32.xlu1 %v1780_v19  ;;  %2009 = vst.msk [vmem:[%s3060_s23 + $0x40] sm:$0xff] %vm2000_vm0, %v1944_v20 }
 0x2b7   : > { %v1590_v22 = vpop.f32.mrf.mxu1  ;;  %v1820_v23 = vpop.xlane.xlu1 %1819 }
 0x2b8   : > { %v1591_v24 = vadd.f32 %v2946_v27, %v1590_v22  ;;  %v1945_v25 = vadd.f32 %v3054_v45, %v1820_v23  ;;  %v1781_v26 = vmul.f32 %v2956_v38, %v1710_v14 }
 0x2b9   : > { %v1592_v63 = vpop.f32.mrf.mxu1 }
 0x2ba   : > { %v1711_v28 = vmax.f32 %v1591_v24, 0.0  ;;  %2010 = vst.msk [vmem:[%s3060_s23 + $0x48] sm:$0xff] %vm2000_vm0, %v1945_v25  ;;  %1889 = vadd.xlane.f32.xlu0 %v1781_v26 }
 0x2bb   : > { %v1595_v60 = vpop.f32.mrf.mxu1  ;;  %v1822_v30 = vpop.xlane.xlu0 %1821 }
 0x2bc   : > { %v1596_v29 = vadd.f32 %v2946_v27, %v1595_v60  ;;  %v1782_v1 = vmul.f32 %v2956_v38, %v1711_v28  ;;  %v1946_v31 = vadd.f32 %v3054_v45, %v1822_v30 }
 0x2bd   : > { %v1597_v32 = vpop.f32.mrf.mxu1 }
 0x2be   : > { %v1712_v33 = vmax.f32 %v1596_v29, 0.0  ;;  %1891 = vadd.xlane.f32.xlu1 %v1782_v1  ;;  %2011 = vst.msk [vmem:[%s3060_s23 + $0x50] sm:$0xff] %vm2000_vm0, %v1946_v31 }
 0x2bf   : > { %v1598_v34 = vpop.f32.mrf.mxu1  ;;  %v1824_v35 = vpop.xlane.xlu1 %1823 }
 0x2c0   : > { %v1599_v36 = vadd.f32 %v2946_v27, %v1598_v34  ;;  %v1947_v61 = vadd.f32 %v3054_v45, %v1824_v35  ;;  %v1783_v37 = vmul.f32 %v2956_v38, %v1712_v33 }
 0x2c1   : > { %v1600_v39 = vpop.f32.mrf.mxu1 }
 0x2c2   : > { %v1713_v40 = vmax.f32 %v1599_v36, 0.0  ;;  %2012 = vst.msk [vmem:[%s3060_s23 + $0x58] sm:$0xff] %vm2000_vm0, %v1947_v61  ;;  %1893 = vadd.xlane.f32.xlu0 %v1783_v37 }
 0x2c3   : > { %v1603_v41 = vpop.f32.mrf.mxu1  ;;  %v1826_v7 = vpop.xlane.xlu0 %1825 }
 0x2c4   : > { %v1604_v42 = vadd.f32 %v2946_v27, %v1603_v41  ;;  %v1948_v43 = vadd.f32 %v3054_v45, %v1826_v7  ;;  %v1784_v44 = vmul.f32 %v2956_v38, %v1713_v40 }
 0x2c5   : > { %v1605_v59 = vpop.f32.mrf.mxu1 }
 0x2c6   : > { %v1714_v46 = vmax.f32 %v1604_v42, 0.0  ;;  %2013 = vst.msk [vmem:[%s3060_s23 + $0x60] sm:$0xff] %vm2000_vm0, %v1948_v43  ;;  %1895 = vadd.xlane.f32.xlu1 %v1784_v44 }
 0x2c7   : > { %v1606_v47 = vpop.f32.mrf.mxu1  ;;  %v1828_v3 = vpop.xlane.xlu1 %1827 }
 0x2c8   : > { %v1607_v48 = vadd.f32 %v2946_v27, %v1606_v47  ;;  %v1949_v49 = vadd.f32 %v3054_v45, %v1828_v3  ;;  %v1802_v50 = vpop.xlane.xlu0 %1801  ;;  %v1785_v51 = vmul.f32 %v2956_v38, %v1714_v46 }
 0x2c9   : > { %v1936_v52 = vadd.f32 %v3054_v45, %v1802_v50  ;;  %v1608_v53 = vpop.f32.mrf.mxu1 }
 0x2ca   : > { %v1715_v54 = vmax.f32 %v1607_v48, 0.0  ;;  %2014 = vst.msk [vmem:[%s3060_s23 + $0x68] sm:$0xff] %vm2000_vm0, %v1949_v49  ;;  %1897 = vadd.xlane.f32.xlu0 %v1785_v51 }
 0x2cb   : > { %2001 = vst.msk [vmem:[%s3060_s23] sm:$0xff] %vm2000_vm0, %v1936_v52  ;;  %v1611_v55 = vpop.f32.mrf.mxu1 }
 0x2cc   : > { %v1612_v56 = vadd.f32 %v2946_v27, %v1611_v55  ;;  %v1804_v57 = vpop.xlane.xlu0 %1803  ;;  %v1786_v58 = vmul.f32 %v2956_v38, %v1715_v54 }
 0x2cd   : > { %v1937_v62 = vadd.f32 %v3054_v45, %v1804_v57  ;;  %v1613_v5 = vpop.f32.mrf.mxu1  ;;  %v1806_v0 = vpop.xlane.xlu1 %1805 }
 0x2ce   : > { %v1716_v4 = vmax.f32 %v1612_v56, 0.0  ;;  %v1938_v6 = vadd.f32 %v3054_v45, %v1806_v0  ;;  %1899 = vadd.xlane.f32.xlu1 %v1786_v58 }
 0x2cf   : > { %2002 = vst.msk [vmem:[%s3060_s23 + $0x8] sm:$0xff] %vm2000_vm0, %v1937_v62  ;;  %v1614_v8 = vpop.f32.mrf.mxu1 }
 0x2d0   : > { %2003 = vst.msk [vmem:[%s3060_s23 + $0x10] sm:$0xff] %vm2000_vm0, %v1938_v6  ;;  %v1615_v9 = vadd.f32 %v2946_v27, %v1614_v8  ;;  %v1830_v10 = vpop.xlane.xlu0 %1829  ;;  %v1787_v2 = vmul.f32 %v2956_v38, %v1716_v4 }
 0x2d1   : > { %v1950_v11 = vadd.f32 %v3054_v45, %v1830_v10  ;;  %v1616_v12 = vpop.f32.mrf.mxu1  ;;  %v1832_v15 = vpop.xlane.xlu1 %1831 }
 0x2d2   : > { %v1717_v16 = vmax.f32 %v1615_v9, 0.0  ;;  %v1951_v17 = vadd.f32 %v3054_v45, %v1832_v15  ;;  %1901 = vadd.xlane.f32.xlu0 %v1787_v2 }
 0x2d3   : > { %2015 = vst.msk [vmem:[%s3060_s23 + $0x70] sm:$0xff] %vm2000_vm0, %v1950_v11  ;;  %v1619_v13 = vpop.f32.mrf.mxu1 }
 0x2d4   : > { %2016 = vst.msk [vmem:[%s3060_s23 + $0x78] sm:$0xff] %vm2000_vm0, %v1951_v17  ;;  %v1620_v18 = vadd.f32 %v2946_v27, %v1619_v13  ;;  %v1834_v19 = vpop.xlane.xlu0 %1833  ;;  %v1788_v20 = vmul.f32 %v2956_v38, %v1717_v16  ;;  %v2405_v17 = vld [vmem:[%s3317_s4] ss:$0 sm:$0xff] }
 0x2d5   : > { %v1952_v21 = vadd.f32 %v3054_v45, %v1834_v19  ;;  %v1621_v14 = vpop.f32.mrf.mxu1  ;;  %v1808_v22 = vpop.xlane.xlu1 %1807 }
 0x2d6   : > { %v1718_v23 = vmax.f32 %v1620_v18, 0.0  ;;  %v1939_v24 = vadd.f32 %v3054_v45, %v1808_v22  ;;  %1903 = vadd.xlane.f32.xlu1 %v1788_v20 }
 0x2d7   : > { %2017 = vst.msk [vmem:[%s3060_s23 + $0x80] sm:$0xff] %vm2000_vm0, %v1952_v21  ;;  %v1622_v25 = vpop.f32.mrf.mxu1 }
 0x2d8   : > { %2004 = vst.msk [vmem:[%s3060_s23 + $0x18] sm:$0xff] %vm2000_vm0, %v1939_v24  ;;  %v1623_v26 = vadd.f32 %v2946_v27, %v1622_v25  ;;  %v1789_v63 = vmul.f32 %v2956_v38, %v1718_v23  ;;  %v2406_v24 = vld [vmem:[%s3318_s5] ss:$0 sm:$0xff] }
 0x2d9   : > { %v1624_v28 = vpop.f32.mrf.mxu1  ;;  %v1836_v60 = vpop.xlane.xlu1 %1835 }
 0x2da   : > { %v1719_v29 = vmax.f32 %v1623_v26, 0.0  ;;  %v1953_v30 = vadd.f32 %v3054_v45, %v1836_v60  ;;  %1905 = vadd.xlane.f32.xlu0 %v1789_v63 }
 0x2db   : > { %v1627_v1 = vpop.f32.mrf.mxu1  ;;  %v1838_v31 = vpop.xlane.xlu0 %1837 }
 0x2dc   : > { %2018 = vst.msk [vmem:[%s3060_s23 + $0x88] sm:$0xff] %vm2000_vm0, %v1953_v30  ;;  %v1628_v32 = vadd.f32 %v2946_v27, %v1627_v1  ;;  %v1954_v33 = vadd.f32 %v3054_v45, %v1838_v31  ;;  %v1790_v34 = vmul.f32 %v2956_v38, %v1719_v29 }
 0x2dd   : > { %v1629_v35 = vpop.f32.mrf.mxu1 }
 0x2de   : > { %v1720_v36 = vmax.f32 %v1628_v32, 0.0  ;;  %2019 = vst.msk [vmem:[%s3060_s23 + $0x90] sm:$0xff] %vm2000_vm0, %v1954_v33  ;;  %1907 = vadd.xlane.f32.xlu1 %v1790_v34 }
 0x2df   : > { %v1630_v61 = vpop.f32.mrf.mxu1  ;;  %v1840_v37 = vpop.xlane.xlu1 %1839 }
 0x2e0   : > { %v1631_v39 = vadd.f32 %v2946_v27, %v1630_v61  ;;  %v1955_v40 = vadd.f32 %v3054_v45, %v1840_v37  ;;  %v1791_v41 = vmul.f32 %v2956_v38, %v1720_v36 }
 0x2e1   : > { %v1632_v7 = vpop.f32.mrf.mxu1 }
 0x2e2   : > { %v1721_v42 = vmax.f32 %v1631_v39, 0.0  ;;  %2020 = vst.msk [vmem:[%s3060_s23 + $0x98] sm:$0xff] %vm2000_vm0, %v1955_v40  ;;  %1909 = vadd.xlane.f32.xlu0 %v1791_v41 }
 0x2e3   : > { %v1635_v43 = vpop.f32.mrf.mxu1  ;;  %v1842_v44 = vpop.xlane.xlu0 %1841 }
 0x2e4   : > { %v1636_v59 = vadd.f32 %v2946_v27, %v1635_v43  ;;  %v1956_v46 = vadd.f32 %v3054_v45, %v1842_v44  ;;  %v1792_v47 = vmul.f32 %v2956_v38, %v1721_v42 }
 0x2e5   : > { %v1637_v3 = vpop.f32.mrf.mxu1 }
 0x2e6   : > { %v1722_v48 = vmax.f32 %v1636_v59, 0.0  ;;  %2021 = vst.msk [vmem:[%s3060_s23 + $0xa0] sm:$0xff] %vm2000_vm0, %v1956_v46  ;;  %1911 = vadd.xlane.f32.xlu1 %v1792_v47 }
 0x2e7   : > { %v1638_v49 = vpop.f32.mrf.mxu1  ;;  %v1844_v50 = vpop.xlane.xlu1 %1843 }
 0x2e8   : > { %v1639_v51 = vadd.f32 %v2946_v27, %v1638_v49  ;;  %v1957_v52 = vadd.f32 %v3054_v45, %v1844_v50  ;;  %v1793_v53 = vmul.f32 %v2956_v38, %v1722_v48 }
 0x2e9   : > { %v1640_v54 = vpop.f32.mrf.mxu1 }
 0x2ea   : > { %v1723_v55 = vmax.f32 %v1639_v51, 0.0  ;;  %2022 = vst.msk [vmem:[%s3060_s23 + $0xa8] sm:$0xff] %vm2000_vm0, %v1957_v52  ;;  %1913 = vadd.xlane.f32.xlu0 %v1793_v53 }
 0x2eb   : > { %v1643_v56 = vpop.f32.mrf.mxu1  ;;  %v1846_v57 = vpop.xlane.xlu0 %1845 }
 0x2ec   : > { %v1644_v58 = vadd.f32 %v2946_v27, %v1643_v56  ;;  %v1958_v62 = vadd.f32 %v3054_v45, %v1846_v57  ;;  %v1794_v5 = vmul.f32 %v2956_v38, %v1723_v55 }
 0x2ed   : > { %v1645_v0 = vpop.f32.mrf.mxu1 }
 0x2ee   : > { %v1724_v4 = vmax.f32 %v1644_v58, 0.0  ;;  %2023 = vst.msk [vmem:[%s3060_s23 + $0xb0] sm:$0xff] %vm2000_vm0, %v1958_v62  ;;  %1915 = vadd.xlane.f32.xlu1 %v1794_v5 }
 0x2ef   : > { %v1646_v6 = vpop.f32.mrf.mxu1  ;;  %v1848_v8 = vpop.xlane.xlu1 %1847 }
 0x2f0   : > { %v1647_v9 = vadd.f32 %v2946_v27, %v1646_v6  ;;  %v1959_v10 = vadd.f32 %v3054_v45, %v1848_v8  ;;  %v1795_v2 = vmul.f32 %v2956_v38, %v1724_v4 }
 0x2f1   : > { %v1648_v11 = vpop.f32.mrf.mxu1 }
 0x2f2   : > { %v1725_v12 = vmax.f32 %v1647_v9, 0.0  ;;  %2024 = vst.msk [vmem:[%s3060_s23 + $0xb8] sm:$0xff] %vm2000_vm0, %v1959_v10  ;;  %1917 = vadd.xlane.f32.xlu0 %v1795_v2 }
 0x2f3   : > { %v1651_v15 = vpop.f32.mrf.mxu1  ;;  %v1850_v16 = vpop.xlane.xlu0 %1849 }
 0x2f4   : > { %v1652_v13 = vadd.f32 %v2405_v17, %v1651_v15  ;;  %v1960_v18 = vadd.f32 %v3054_v45, %v1850_v16  ;;  %v1796_v27 = vmul.f32 %v2956_v38, %v1725_v12 }
 0x2f5   : > { %v1653_v19 = vpop.f32.mrf.mxu1 }
 0x2f6   : > { %v1726_v20 = vmax.f32 %v1652_v13, 0.0  ;;  %2025 = vst.msk [vmem:[%s3060_s23 + $0xc0] sm:$0xff] %vm2000_vm0, %v1960_v18  ;;  %1919 = vadd.xlane.f32.xlu1 %v1796_v27 }
 0x2f7   : > { %v1654_v21 = vpop.f32.mrf.mxu1  ;;  %v1852_v14 = vpop.xlane.xlu1 %1851 }
 0x2f8   : > { %v1655_v22 = vadd.f32 %v2405_v17, %v1654_v21  ;;  %v1961_v23 = vadd.f32 %v3054_v45, %v1852_v14  ;;  %v1797_v25 = vmul.f32 %v2406_v24, %v1726_v20 }
 0x2f9   : > { %v1656_v26 = vpop.f32.mrf.mxu1 }
 0x2fa   : > { %v1727_v63 = vmax.f32 %v1655_v22, 0.0  ;;  %2026 = vst.msk [vmem:[%s3060_s23 + $0xc8] sm:$0xff] %vm2000_vm0, %v1961_v23  ;;  %1921 = vadd.xlane.f32.xlu0 %v1797_v25 }
 0x2fb   : > { %v1659_v38 = vpop.f32.mrf.mxu1  ;;  %v1854_v28 = vpop.xlane.xlu0 %1853 }
 0x2fc   : > { %v1660_v60 = vadd.f32 %v2405_v17, %v1659_v38  ;;  %v1962_v29 = vadd.f32 %v3054_v45, %v1854_v28  ;;  %v1798_v30 = vmul.f32 %v2406_v24, %v1727_v63 }
 0x2fd   : > { %v1661_v1 = vpop.f32.mrf.mxu1 }
 0x2fe   : > { %v1728_v31 = vmax.f32 %v1660_v60, 0.0  ;;  %2027 = vst.msk [vmem:[%s3060_s23 + $0xd0] sm:$0xff] %vm2000_vm0, %v1962_v29  ;;  %1923 = vadd.xlane.f32.xlu1 %v1798_v30 }
 0x2ff   : > { %v1662_v32 = vpop.f32.mrf.mxu1  ;;  %v1856_v33 = vpop.xlane.xlu1 %1855 }
 0x300   : > { %v1663_v34 = vadd.f32 %v2405_v17, %v1662_v32  ;;  %v1963_v35 = vadd.f32 %v3054_v45, %v1856_v33  ;;  %v1799_v36 = vmul.f32 %v2406_v24, %v1728_v31 }
 0x301   : > { %v1664_v61 = vpop.f32.mrf.mxu1 }
 0x302   : > { %v1729_v37 = vmax.f32 %v1663_v34, 0.0  ;;  %2028 = vst.msk [vmem:[%s3060_s23 + $0xd8] sm:$0xff] %vm2000_vm0, %v1963_v35  ;;  %1925 = vadd.xlane.f32.xlu0 %v1799_v36 }
 0x303   : > { %v1858_v39 = vpop.xlane.xlu0 %1857 }
 0x304   : > { %v1964_v40 = vadd.f32 %v3054_v45, %v1858_v39  ;;  %v1800_v41 = vmul.f32 %v2406_v24, %v1729_v37 }
 0x306   : > { %2029 = vst.msk [vmem:[%s3060_s23 + $0xe0] sm:$0xff] %vm2000_vm0, %v1964_v40  ;;  %1927 = vadd.xlane.f32.xlu1 %v1800_v41 }
 0x307   : > { %v1860_v7 = vpop.xlane.xlu1 %1859 }
 0x308   : > { %v1965_v42 = vadd.f32 %v3054_v45, %v1860_v7 }
 0x30a   : > { %2030 = vst.msk [vmem:[%s3060_s23 + $0xe8] sm:$0xff] %vm2000_vm0, %v1965_v42 }
 0x30b   : > { %v1862_v43 = vpop.xlane.xlu0 %1861 }
 0x30c   : > { %v1966_v44 = vadd.f32 %v3054_v45, %v1862_v43 }
 0x30e   : > { %2031 = vst.msk [vmem:[%s3060_s23 + $0xf0] sm:$0xff] %vm2000_vm0, %v1966_v44 }
 0x30f   : > { %v1864_v59 = vpop.xlane.xlu1 %1863 }
 0x310   : > { %v1967_v46 = vadd.f32 %v3054_v45, %v1864_v59 }
 0x312   : > { %2032 = vst.msk [vmem:[%s3060_s23 + $0xf8] sm:$0xff] %vm2000_vm0, %v1967_v46 }
 0x313   : > { %v1866_v47 = vpop.xlane.xlu0 %1865 }
 0x314   : > { %v1968_v3 = vadd.f32 %v3054_v45, %v1866_v47 }
 0x316   : > { %2033 = vst.msk [vmem:[%s3060_s23 + $0x100] sm:$0xff] %vm2000_vm0, %v1968_v3 }
 0x317   : > { %v1868_v48 = vpop.xlane.xlu1 %1867 }
 0x318   : > { %v1969_v49 = vadd.f32 %v3054_v45, %v1868_v48 }
 0x31a   : > { %2034 = vst.msk [vmem:[%s3060_s23 + $0x108] sm:$0xff] %vm2000_vm0, %v1969_v49 }
 0x31b   : > { %v1870_v50 = vpop.xlane.xlu0 %1869 }
 0x31c   : > { %v1970_v51 = vadd.f32 %v3054_v45, %v1870_v50 }
 0x31e   : > { %2035 = vst.msk [vmem:[%s3060_s23 + $0x110] sm:$0xff] %vm2000_vm0, %v1970_v51 }
 0x31f   : > { %v1872_v52 = vpop.xlane.xlu1 %1871 }
 0x320   : > { %v1971_v53 = vadd.f32 %v3054_v45, %v1872_v52 }
 0x322   : > { %2036 = vst.msk [vmem:[%s3060_s23 + $0x118] sm:$0xff] %vm2000_vm0, %v1971_v53 }
 0x323   : > { %v1874_v54 = vpop.xlane.xlu0 %1873 }
 0x324   : > { %v1972_v55 = vadd.f32 %v3054_v45, %v1874_v54 }
 0x326   : > { %2037 = vst.msk [vmem:[%s3060_s23 + $0x120] sm:$0xff] %vm2000_vm0, %v1972_v55 }
 0x327   : > { %v1876_v56 = vpop.xlane.xlu1 %1875 }
 0x328   : > { %v1973_v57 = vadd.f32 %v3054_v45, %v1876_v56 }
 0x32a   : > { %2038 = vst.msk [vmem:[%s3060_s23 + $0x128] sm:$0xff] %vm2000_vm0, %v1973_v57 }
 0x32b   : > { %v1878_v58 = vpop.xlane.xlu0 %1877 }
 0x32c   : > { %v1974_v62 = vadd.f32 %v3054_v45, %v1878_v58 }
 0x32e   : > { %2039 = vst.msk [vmem:[%s3060_s23 + $0x130] sm:$0xff] %vm2000_vm0, %v1974_v62 }
 0x32f   : > { %v1880_v5 = vpop.xlane.xlu1 %1879 }
 0x330   : > { %v1975_v0 = vadd.f32 %v3054_v45, %v1880_v5 }
 0x332   : > { %2040 = vst.msk [vmem:[%s3060_s23 + $0x138] sm:$0xff] %vm2000_vm0, %v1975_v0 }
 0x333   : > { %v1882_v4 = vpop.xlane.xlu0 %1881 }
 0x334   : > { %v1976_v6 = vadd.f32 %v3054_v45, %v1882_v4 }
 0x336   : > { %2041 = vst.msk [vmem:[%s3060_s23 + $0x140] sm:$0xff] %vm2000_vm0, %v1976_v6 }
 0x337   : > { %v1884_v8 = vpop.xlane.xlu1 %1883 }
 0x338   : > { %v1977_v9 = vadd.f32 %v3054_v45, %v1884_v8 }
 0x33a   : > { %2042 = vst.msk [vmem:[%s3060_s23 + $0x148] sm:$0xff] %vm2000_vm0, %v1977_v9 }
 0x33b   : > { %v1886_v10 = vpop.xlane.xlu0 %1885 }
 0x33c   : > { %v1978_v2 = vadd.f32 %v3054_v45, %v1886_v10 }
 0x33e   : > { %2043 = vst.msk [vmem:[%s3060_s23 + $0x150] sm:$0xff] %vm2000_vm0, %v1978_v2 }
 0x33f   : > { %v1888_v11 = vpop.xlane.xlu1 %1887 }
 0x340   : > { %v1979_v12 = vadd.f32 %v3054_v45, %v1888_v11 }
 0x342   : > { %2044 = vst.msk [vmem:[%s3060_s23 + $0x158] sm:$0xff] %vm2000_vm0, %v1979_v12 }
 0x343   : > { %v1890_v15 = vpop.xlane.xlu0 %1889 }
 0x344   : > { %v1980_v16 = vadd.f32 %v3054_v45, %v1890_v15 }
 0x346   : > { %2045 = vst.msk [vmem:[%s3060_s23 + $0x160] sm:$0xff] %vm2000_vm0, %v1980_v16 }
 0x347   : > { %v1892_v17 = vpop.xlane.xlu1 %1891 }
 0x348   : > { %v1981_v13 = vadd.f32 %v3054_v45, %v1892_v17 }
 0x34a   : > { %2046 = vst.msk [vmem:[%s3060_s23 + $0x168] sm:$0xff] %vm2000_vm0, %v1981_v13 }
 0x34b   : > { %v1894_v18 = vpop.xlane.xlu0 %1893 }
 0x34c   : > { %v1982_v27 = vadd.f32 %v3054_v45, %v1894_v18 }
 0x34e   : > { %2047 = vst.msk [vmem:[%s3060_s23 + $0x170] sm:$0xff] %vm2000_vm0, %v1982_v27 }
 0x34f   : > { %v1896_v19 = vpop.xlane.xlu1 %1895 }
 0x350   : > { %v1983_v20 = vadd.f32 %v3054_v45, %v1896_v19 }
 0x352   : > { %2048 = vst.msk [vmem:[%s3060_s23 + $0x178] sm:$0xff] %vm2000_vm0, %v1983_v20 }
 0x353   : > { %v1898_v21 = vpop.xlane.xlu0 %1897 }
 0x354   : > { %v1984_v14 = vadd.f32 %v3054_v45, %v1898_v21 }
 0x356   : > { %2049 = vst.msk [vmem:[%s3060_s23 + $0x180] sm:$0xff] %vm2000_vm0, %v1984_v14 }
 0x357   : > { %v1900_v22 = vpop.xlane.xlu1 %1899 }
 0x358   : > { %v1985_v23 = vadd.f32 %v3054_v45, %v1900_v22 }
 0x35a   : > { %2050 = vst.msk [vmem:[%s3060_s23 + $0x188] sm:$0xff] %vm2000_vm0, %v1985_v23 }
 0x35b   : > { %v1902_v24 = vpop.xlane.xlu0 %1901 }
 0x35c   : > { %v1986_v25 = vadd.f32 %v3054_v45, %v1902_v24 }
 0x35e   : > { %2051 = vst.msk [vmem:[%s3060_s23 + $0x190] sm:$0xff] %vm2000_vm0, %v1986_v25 }
 0x35f   : > { %v1904_v26 = vpop.xlane.xlu1 %1903 }
 0x360   : > { %v1987_v63 = vadd.f32 %v3054_v45, %v1904_v26 }
 0x362   : > { %2052 = vst.msk [vmem:[%s3060_s23 + $0x198] sm:$0xff] %vm2000_vm0, %v1987_v63 }
 0x363   : > { %v1906_v38 = vpop.xlane.xlu0 %1905 }
 0x364   : > { %v1988_v28 = vadd.f32 %v3054_v45, %v1906_v38 }
 0x366   : > { %2053 = vst.msk [vmem:[%s3060_s23 + $0x1a0] sm:$0xff] %vm2000_vm0, %v1988_v28 }
 0x367   : > { %v1908_v60 = vpop.xlane.xlu1 %1907 }
 0x368   : > { %v1989_v29 = vadd.f32 %v3054_v45, %v1908_v60 }
 0x36a   : > { %2054 = vst.msk [vmem:[%s3060_s23 + $0x1a8] sm:$0xff] %vm2000_vm0, %v1989_v29 }
 0x36b   : > { %v1910_v30 = vpop.xlane.xlu0 %1909 }
 0x36c   : > { %v1990_v1 = vadd.f32 %v3054_v45, %v1910_v30 }
 0x36e   : > { %2055 = vst.msk [vmem:[%s3060_s23 + $0x1b0] sm:$0xff] %vm2000_vm0, %v1990_v1 }
 0x36f   : > { %v1912_v31 = vpop.xlane.xlu1 %1911 }
 0x370   : > { %v1991_v32 = vadd.f32 %v3054_v45, %v1912_v31 }
 0x372   : > { %2056 = vst.msk [vmem:[%s3060_s23 + $0x1b8] sm:$0xff] %vm2000_vm0, %v1991_v32 }
 0x373   : > { %v1914_v33 = vpop.xlane.xlu0 %1913 }
 0x374   : > { %v1992_v34 = vadd.f32 %v3054_v45, %v1914_v33 }
 0x376   : > { %2057 = vst.msk [vmem:[%s3060_s23 + $0x1c0] sm:$0xff] %vm2000_vm0, %v1992_v34 }
 0x377   : > { %v1916_v35 = vpop.xlane.xlu1 %1915 }
 0x378   : > { %v1993_v36 = vadd.f32 %v3054_v45, %v1916_v35 }
 0x37a   : > { %2058 = vst.msk [vmem:[%s3060_s23 + $0x1c8] sm:$0xff] %vm2000_vm0, %v1993_v36 }
 0x37b   : > { %v1918_v61 = vpop.xlane.xlu0 %1917 }
 0x37c   : > { %v1994_v37 = vadd.f32 %v3054_v45, %v1918_v61 }
 0x37e   : > { %2059 = vst.msk [vmem:[%s3060_s23 + $0x1d0] sm:$0xff] %vm2000_vm0, %v1994_v37 }
 0x37f   : > { %v1920_v39 = vpop.xlane.xlu1 %1919 }
 0x380   : > { %v1995_v40 = vadd.f32 %v3054_v45, %v1920_v39 }
 0x382   : > { %2060 = vst.msk [vmem:[%s3060_s23 + $0x1d8] sm:$0xff] %vm2000_vm0, %v1995_v40 }
 0x383   : > { %v1922_v41 = vpop.xlane.xlu0 %1921 }
 0x384   : > { %v1996_v7 = vadd.f32 %v3054_v45, %v1922_v41 }
 0x386   : > { %2061 = vst.msk [vmem:[%s3060_s23 + $0x1e0] sm:$0xff] %vm2000_vm0, %v1996_v7 }
 0x387   : > { %v1924_v42 = vpop.xlane.xlu1 %1923 }
 0x388   : > { %v1997_v43 = vadd.f32 %v3054_v45, %v1924_v42 }
 0x38a   : > { %2062 = vst.msk [vmem:[%s3060_s23 + $0x1e8] sm:$0xff] %vm2000_vm0, %v1997_v43 }
 0x38b   : > { %v1926_v44 = vpop.xlane.xlu0 %1925 }
 0x38c   : > { %v1998_v59 = vadd.f32 %v3054_v45, %v1926_v44 }
 0x38e   : > { %2063 = vst.msk [vmem:[%s3060_s23 + $0x1f0] sm:$0xff] %vm2000_vm0, %v1998_v59 }
 0x38f   : > { %v1928_v46 = vpop.xlane.xlu1 %1927 }
 0x390   : > { %v1999_v47 = vadd.f32 %v3054_v45, %v1928_v46 }
 0x392   : > { %2064 = vst.msk [vmem:[%s3060_s23 + $0x1f8] sm:$0xff] %vm2000_vm0, %v1999_v47 }
 0x393 PF: > { %p20_p10 = scmp.ge.s32.totalorder %s2646_s25, 4   ;;  %s3333_s26 = smov %s2517_s27 }
 0x394   : > { %s3334_s27 = smov %s2521_s28  ;;  %s3335_s28 = smov %s2655_s11 }
 0x395   : > { %s3336_s29 = smov %s2646_s25  ;;  %22 = sbr.rel (!%p20_p10) target bundleno = 7 (0x7), region = 96 }
 0x39a   :  { %2087 = vsyncpa [#allocation4], 1 }
 0x39b   :  { %2089 = vsyncpa [#allocation4 + $0x1], 1 }
 0x39c   :  { %2090 = vsyncpa [#allocation6], 1 }

</bundles_post_ra>
